<compile_context>
chip_gen: v7x
topology: tpu7x:2x2x1
jax: 0.10.0
libtpu: 0.0.40
codegen_flags: <defaults>
</compile_context>

<pallas_src>
import math
from functools import partial

import jax
import jax.numpy as jnp
from jax.experimental import pallas as pl
from jax.experimental.pallas import tpu as pltpu


# ----------------------------------------------------------------------------
# Model configuration (small, synthetic)
# ----------------------------------------------------------------------------
DIM          = 64                       # true model dim
D_PAD        = 128                      # lane-dense padded model dim
N_LAYERS     = 2
N_HEADS      = 4
N_KV_HEADS   = 2
VOCAB_SIZE   = 96
VOCAB_PAD    = 128                      # lane-dense padded vocab
MULTIPLE_OF  = 32
NORM_EPS     = 1e-5
MAX_SEQ_LEN  = 16
MAX_BATCH    = 2
HEAD_DIM     = DIM // N_HEADS           # 16
N_REP        = N_HEADS // N_KV_HEADS    # 2
Q_DIM        = N_HEADS * HEAD_DIM       # 64
KV_DIM       = N_KV_HEADS * HEAD_DIM    # 32
QKV_DIM      = Q_DIM + 2 * KV_DIM       # 128 (lane-dense fused QKV output)
CACHE_W      = 2 * KV_DIM               # packed [K | V] cache row width (64)


def _ffn_hidden_dim(dim, multiple_of):
    hidden = 4 * dim
    hidden = int(2 * hidden / 3)
    return multiple_of * ((hidden + multiple_of - 1) // multiple_of)


FFN_HIDDEN = _ffn_hidden_dim(DIM, MULTIPLE_OF)   # 192

_VMEM = pl.BlockSpec(memory_space=pltpu.MemorySpace.VMEM)
_SMEM = pl.BlockSpec(memory_space=pltpu.MemorySpace.SMEM)
_ANY  = pl.BlockSpec(memory_space=pl.ANY)


# ----------------------------------------------------------------------------
# Pallas kernels
# ----------------------------------------------------------------------------
def _layer_kernel(start_ref, x_ref, attn_norm_ref, ffn_norm_ref,
                  wqkv_ref, wo_ref, w1_ref, w3_ref, w2_ref,
                  prot_ref, cos_ref, sin_ref, mask_ref, cache_in_ref,
                  h_out_ref, cache_out_ref,
                  kv_buf, dma_sems, *, S, eps, scale):
    """One full transformer block for a single batch element (grid over batch).

    x:        (S, D_PAD) f32, pad lanes zero
    wqkv:     (D_PAD, QKV_DIM) bf16  (merged wq|wk|wv)
    wo:       (Q_DIM, D_PAD) bf16
    w1/w3:    (D_PAD, FFN_HIDDEN) bf16, w2: (FFN_HIDDEN, D_PAD) bf16
    prot:     (Q_DIM, Q_DIM) bf16 signed pair-permutation for interleaved RoPE
    cos/sin:  (S, HEAD_DIM) f32 compact tables for positions [start, start+S)
    mask:     (S, MAX_SEQ_LEN) f32 (causal + validity, -inf outside)
    cache:    (MAX_BATCH*MAX_SEQ_LEN, CACHE_W) f32 in HBM, row = b*MAX+pos,
              cols [0:KV_DIM)=K, [KV_DIM:2*KV_DIM)=V  (aliased input/output)
    """
    b = pl.program_id(0)
    start = start_ref[0]

    # Prefetch this batch's packed [K|V] cache window (HBM -> VMEM).  Overlaps
    # with the RMSNorm + QKV + RoPE compute below.
    load_cp = pltpu.make_async_copy(
        cache_in_ref.at[pl.ds(b * MAX_SEQ_LEN, MAX_SEQ_LEN)],
        kv_buf, dma_sems.at[0])
    load_cp.start()

    x = x_ref[...]                                              # (S, D_PAD) f32

    # ---- RMSNorm (attention) fused with the QKV projection; pad lanes are 0,
    # so summing all 128 lanes and dividing by the true DIM is exact. ----
    ms = jnp.sum(x * x, axis=-1, keepdims=True) * (1.0 / DIM)
    xn = x * jax.lax.rsqrt(ms + eps) * attn_norm_ref[...]

    qkv = jnp.dot(xn.astype(jnp.bfloat16), wqkv_ref[...],
                  preferred_element_type=jnp.float32)           # (S, 128)
    q = qkv[:, :Q_DIM]                                          # (S, 64)
    kv = qkv[:, Q_DIM:]                                         # (S, 64) = [K|V]

    # ---- RoPE (interleaved pairs). cos/sin broadcast once (hoisted). The
    # V half of the packed kv slab passes through untouched (cos=1, sin=0). ----
    cos = cos_ref[...]
    sin = sin_ref[...]
    cos_q = jnp.tile(cos, (1, N_HEADS))                         # (S, 64)
    sin_q = jnp.tile(sin, (1, N_HEADS))
    cos_kv = jnp.concatenate(
        [jnp.tile(cos, (1, N_KV_HEADS)), jnp.ones((S, KV_DIM), jnp.float32)],
        axis=-1)                                                # (S, 64)
    sin_kv = jnp.concatenate(
        [jnp.tile(sin, (1, N_KV_HEADS)), jnp.zeros((S, KV_DIM), jnp.float32)],
        axis=-1)

    prot = prot_ref[...]                                        # bf16, exact +-1
    q_rot = jnp.dot(q.astype(jnp.bfloat16), prot,
                    preferred_element_type=jnp.float32)
    kv_rot = jnp.dot(kv.astype(jnp.bfloat16), prot,
                     preferred_element_type=jnp.float32)
    q = q * cos_q + q_rot * sin_q
    kv = kv * cos_kv + kv_rot * sin_kv

    # ---- KV-cache update: insert the S new rows into the VMEM window and
    # write back ONLY those rows to the aliased HBM cache (O(S) update). ----
    load_cp.wait()
    # NOTE: caller must guarantee start + S <= MAX_SEQ_LEN (no OOB check on TPU).
    kv_buf[pl.ds(start, S), :] = kv
    wb_cp = pltpu.make_async_copy(
        kv_buf.at[pl.ds(start, S)],
        cache_out_ref.at[pl.ds(b * MAX_SEQ_LEN + start, S)],
        dma_sems.at[1])
    wb_cp.start()

    # ---- Attention over the full cache window (invalid columns masked).
    # GQA: the N_REP q-heads sharing a kv-head are stacked along sublanes and
    # handled by one score + one PV matmul; PV results are accumulated straight
    # into the wo projection (no concatenates, no lane reassembly). ----
    kv_all = kv_buf[...]                                        # (MAX_SEQ_LEN, 64)
    mask = jnp.tile(mask_ref[...], (N_REP, 1))                  # (N_REP*S, MAX)
    wo = wo_ref[...]                                            # (Q_DIM, D_PAD)
    h_attn = jnp.zeros((S, D_PAD), jnp.float32)
    for kvh in range(N_KV_HEADS):
        c0 = kvh * N_REP * HEAD_DIM
        q_grp = jnp.concatenate(
            [q[:, c0 + r * HEAD_DIM: c0 + (r + 1) * HEAD_DIM]
             for r in range(N_REP)], axis=0)                    # (N_REP*S, Dh)
        k_grp = kv_all[:, kvh * HEAD_DIM:(kvh + 1) * HEAD_DIM]  # (MAX, Dh)
        v_grp = kv_all[:, KV_DIM + kvh * HEAD_DIM: KV_DIM + (kvh + 1) * HEAD_DIM]
        scores = jax.lax.dot_general(
            q_grp.astype(jnp.bfloat16), k_grp.astype(jnp.bfloat16),
            (((1,), (1,)), ((), ())),
            preferred_element_type=jnp.float32) * scale + mask  # (N_REP*S, MAX)
        m = jnp.max(scores, axis=-1, keepdims=True)
        e = jnp.exp(scores - m)                                 # f32 softmax
        p = e * pl.reciprocal(jnp.sum(e, axis=-1, keepdims=True), approx=True)
        pv = jnp.dot(p.astype(jnp.bfloat16), v_grp.astype(jnp.bfloat16),
                     preferred_element_type=jnp.float32)        # (N_REP*S, Dh)
        for r in range(N_REP):
            hq = kvh * N_REP + r
            h_attn = h_attn + jnp.dot(
                pv[r * S:(r + 1) * S, :].astype(jnp.bfloat16),
                wo[hq * HEAD_DIM:(hq + 1) * HEAD_DIM, :],
                preferred_element_type=jnp.float32)

    h_res = x + h_attn

    # ---- RMSNorm (ffn) fused with SwiGLU FFN + residual ----
    ms2 = jnp.sum(h_res * h_res, axis=-1, keepdims=True) * (1.0 / DIM)
    hn = (h_res * jax.lax.rsqrt(ms2 + eps) * ffn_norm_ref[...]).astype(jnp.bfloat16)
    h1 = jnp.dot(hn, w1_ref[...], preferred_element_type=jnp.float32)
    h3 = jnp.dot(hn, w3_ref[...], preferred_element_type=jnp.float32)
    g = (h1 * jax.nn.sigmoid(h1)) * h3                          # f32 elementwise
    h_out_ref[...] = h_res + jnp.dot(g.astype(jnp.bfloat16), w2_ref[...],
                                     preferred_element_type=jnp.float32)

    wb_cp.wait()


def _final_kernel(h_ref, norm_ref, wout_ref, hn_ref, logits_ref, *, B, S, eps):
    """Final RMSNorm for all rows + output projection for the LAST token only."""
    h = h_ref[...]
    ms = jnp.sum(h * h, axis=-1, keepdims=True) * (1.0 / DIM)
    hn = h * jax.lax.rsqrt(ms + eps) * norm_ref[...]
    hn_ref[...] = hn
    last = jnp.concatenate(
        [hn[b * S + S - 1: b * S + S, :] for b in range(B)], axis=0)  # (B, D_PAD)
    logits_ref[...] = jnp.dot(last.astype(jnp.bfloat16), wout_ref[...],
                              preferred_element_type=jnp.float32)


# ----------------------------------------------------------------------------
# Pallas wrappers
# ----------------------------------------------------------------------------
def _full_spec(arr):
    n = arr.ndim
    return pl.BlockSpec(arr.shape, lambda b: (0,) * n)


def _layer_cost(B, S):
    rows = B * S
    flops = 2 * rows * (D_PAD * QKV_DIM                       # qkv
                        + (Q_DIM + CACHE_W) * Q_DIM           # rope perms
                        + 2 * N_HEADS * MAX_SEQ_LEN * HEAD_DIM  # scores + pv
                        + Q_DIM * D_PAD                       # wo
                        + 2 * D_PAD * FFN_HIDDEN + FFN_HIDDEN * D_PAD)
    transcendentals = rows * (N_HEADS * MAX_SEQ_LEN + FFN_HIDDEN + 2)
    bytes_accessed = (8 * rows * D_PAD
                      + 2 * (D_PAD * QKV_DIM + Q_DIM * D_PAD + Q_DIM * Q_DIM
                             + 2 * D_PAD * FFN_HIDDEN + FFN_HIDDEN * D_PAD)
                      + 8 * MAX_BATCH * MAX_SEQ_LEN * CACHE_W)
    return pl.CostEstimate(flops=int(flops), transcendentals=int(transcendentals),
                           bytes_accessed=int(bytes_accessed))


def pallas_transformer_layer(start_arr, x2d, lp, prot, cos_s, sin_s, mask,
                             cache, *, B, S):
    kernel = partial(_layer_kernel, S=S, eps=NORM_EPS,
                     scale=1.0 / math.sqrt(HEAD_DIM))
    in_specs = [
        _SMEM,                                          # start_pos (runtime scalar)
        pl.BlockSpec((S, D_PAD), lambda b: (b, 0)),     # x rows of batch b
        _full_spec(lp["attn_norm"]), _full_spec(lp["ffn_norm"]),
        _full_spec(lp["wqkv"]), _full_spec(lp["wo"]),
        _full_spec(lp["w1"]), _full_spec(lp["w3"]), _full_spec(lp["w2"]),
        _full_spec(prot), _full_spec(cos_s), _full_spec(sin_s), _full_spec(mask),
        _ANY,                                           # packed KV cache (HBM)
    ]
    out_specs = (pl.BlockSpec((S, D_PAD), lambda b: (b, 0)),  # h_out rows
                 _ANY)                                        # updated cache
    out_shape = (jax.ShapeDtypeStruct((B * S, D_PAD), jnp.float32),
                 jax.ShapeDtypeStruct(cache.shape, cache.dtype))
    return pl.pallas_call(
        kernel,
        out_shape=out_shape,
        grid=(B,),
        in_specs=in_specs,
        out_specs=out_specs,
        scratch_shapes=[pltpu.VMEM((MAX_SEQ_LEN, CACHE_W), jnp.float32),
                        pltpu.SemaphoreType.DMA((2,))],
        input_output_aliases={13: 1},                   # cache updated in place
        compiler_params=pltpu.CompilerParams(
            dimension_semantics=("parallel",),          # shard batches over TCs
            vmem_limit_bytes=32 * 1024 * 1024),
        cost_estimate=_layer_cost(B, S),
    )(start_arr, x2d, lp["attn_norm"], lp["ffn_norm"], lp["wqkv"], lp["wo"],
      lp["w1"], lp["w3"], lp["w2"], prot, cos_s, sin_s, mask, cache)


def pallas_final_norm_logits(h2d, norm_w, wout_pad, *, B, S):
    out_shape = (jax.ShapeDtypeStruct((B * S, D_PAD), jnp.float32),
                 jax.ShapeDtypeStruct((B, VOCAB_PAD), jnp.float32))
    return pl.pallas_call(
        partial(_final_kernel, B=B, S=S, eps=NORM_EPS),
        out_shape=out_shape,
        in_specs=[_VMEM] * 3,
        out_specs=(_VMEM, _VMEM),
    )(h2d, norm_w, wout_pad)


# ----------------------------------------------------------------------------
# Plain-JAX glue: RoPE tables, rotation matrix, params, driver
# ----------------------------------------------------------------------------
def precompute_freqs(dim, end, theta=10000.0):
    freqs = 1.0 / theta ** (jnp.arange(0, dim, 2)[: dim // 2].astype(jnp.float32) / dim)
    t = jnp.arange(end, dtype=jnp.float32)
    angles = jnp.outer(t, freqs)                     # (end, dim//2)
    return jnp.cos(angles), jnp.sin(angles)


def _rope_rotation_matrix(width):
    """P with P[2i, 2i+1]=+1, P[2i+1, 2i]=-1: (x @ P)[2i]=-x[2i+1], [2i+1]=x[2i]."""
    r = jnp.arange(width)[:, None]
    c = jnp.arange(width)[None, :]
    plus = ((c == r + 1) & (r % 2 == 0)).astype(jnp.float32)
    minus = ((c == r - 1) & (r % 2 == 1)).astype(jnp.float32)
    return (plus - minus).astype(jnp.bfloat16)       # entries 0 / +-1: exact


def _pad2d(w, rows, cols):
    return jnp.zeros((rows, cols), w.dtype).at[:w.shape[0], :w.shape[1]].set(w)


def init_params(key):
    def nrm(k, shape, scale_=0.05):
        return scale_ * jax.random.normal(k, shape, dtype=jnp.float32)

    keys = jax.random.split(key, 2 + 7 * N_LAYERS)
    params = {
        "tok_emb": _pad2d(nrm(keys[0], (VOCAB_SIZE, DIM)), VOCAB_SIZE, D_PAD),
        "norm": jnp.ones((1, D_PAD), jnp.float32),
        "output_padded": _pad2d(nrm(keys[1], (DIM, VOCAB_SIZE)),
                                D_PAD, VOCAB_PAD).astype(jnp.bfloat16),
        "layers": [],
    }
    for l in range(N_LAYERS):
        k = keys[2 + 7 * l: 2 + 7 * (l + 1)]
        wqkv = jnp.concatenate([nrm(k[0], (DIM, Q_DIM)),
                                nrm(k[1], (DIM, KV_DIM)),
                                nrm(k[2], (DIM, KV_DIM))], axis=1)
        params["layers"].append({
            "attn_norm": jnp.ones((1, D_PAD), jnp.float32),
            "ffn_norm":  jnp.ones((1, D_PAD), jnp.float32),
            "wqkv": _pad2d(wqkv, D_PAD, QKV_DIM).astype(jnp.bfloat16),
            "wo":   _pad2d(nrm(k[3], (Q_DIM, DIM)), Q_DIM, D_PAD).astype(jnp.bfloat16),
            "w1":   _pad2d(nrm(k[4], (DIM, FFN_HIDDEN)), D_PAD, FFN_HIDDEN).astype(jnp.bfloat16),
            "w3":   _pad2d(nrm(k[5], (DIM, FFN_HIDDEN)), D_PAD, FFN_HIDDEN).astype(jnp.bfloat16),
            "w2":   _pad2d(nrm(k[6], (FFN_HIDDEN, DIM)), FFN_HIDDEN, D_PAD).astype(jnp.bfloat16),
        })
    return params


@partial(jax.jit, donate_argnums=(3,))
def transformer_forward(params, tokens, start_pos, caches):
    """start_pos is a runtime scalar (no recompile across decode/prefill chunks)."""
    B, S = tokens.shape
    start = jnp.asarray(start_pos, jnp.int32)

    h = jnp.take(params["tok_emb"], tokens.reshape(-1), axis=0)       # (B*S, D_PAD)

    # Compact (S, HEAD_DIM) RoPE tables for positions [start, start+S).
    cos_all, sin_all = precompute_freqs(HEAD_DIM, MAX_SEQ_LEN * 2)
    cos_s = jnp.repeat(jax.lax.dynamic_slice_in_dim(cos_all, start, S, axis=0),
                       2, axis=-1)
    sin_s = jnp.repeat(jax.lax.dynamic_slice_in_dim(sin_all, start, S, axis=0),
                       2, axis=-1)

    # Causal + validity mask over the full cache window.
    pos = start + jnp.arange(S, dtype=jnp.int32)
    mask = jnp.where(jnp.arange(MAX_SEQ_LEN, dtype=jnp.int32)[None, :] <= pos[:, None],
                     0.0, -jnp.inf).astype(jnp.float32)               # (S, MAX)

    prot = _rope_rotation_matrix(Q_DIM)
    start_arr = jnp.reshape(start, (1,))

    new_caches = []
    for l in range(N_LAYERS):
        h, cache = pallas_transformer_layer(
            start_arr, h, params["layers"][l], prot, cos_s, sin_s, mask,
            caches[l], B=B, S=S)
        new_caches.append(cache)

    hn, logits_pad = pallas_final_norm_logits(
        h, params["norm"], params["output_padded"], B=B, S=S)
    logits = logits_pad[:, :VOCAB_SIZE]
    hn = hn.reshape(B, S, D_PAD)[:, :, :DIM]
    return logits.astype(jnp.float32), hn, new_caches


# ----------------------------------------------------------------------------
# Main
# ----------------------------------------------------------------------------
if __name__ == "__main__":
    key = jax.random.PRNGKey(0)
    kp, kt1, kt2 = jax.random.split(key, 3)

    params = init_params(kp)

    B, S = 2, 8
    # Packed KV cache per layer: row = b * MAX_SEQ_LEN + pos, cols = [K | V].
    caches = [jnp.zeros((MAX_BATCH * MAX_SEQ_LEN, CACHE_W), jnp.float32)
              for _ in range(N_LAYERS)]

    # Chunk 1: positions [0, 8).
    tokens1 = jax.random.randint(kt1, (B, S), 0, VOCAB_SIZE, dtype=jnp.int32)
    logits, h, caches = transformer_forward(params, tokens1, 0, caches)
    jax.block_until_ready((logits, h, caches))
    assert logits.shape == (B, VOCAB_SIZE)
    assert h.shape == (B, S, DIM)
    assert bool(jnp.all(jnp.isfinite(logits))) and bool(jnp.all(jnp.isfinite(h)))

    # Chunk 2: positions [8, 16) — same compiled kernels (runtime start_pos),
    # exercises the aliased KV-cache read/writeback path.
    tokens2 = jax.random.randint(kt2, (B, S), 0, VOCAB_SIZE, dtype=jnp.int32)
    logits2, h2, caches = transformer_forward(params, tokens2, 8, caches)
    jax.block_until_ready((logits2, h2, caches))
    assert logits2.shape == (B, VOCAB_SIZE)
    assert bool(jnp.all(jnp.isfinite(logits2))) and bool(jnp.all(jnp.isfinite(h2)))

    print("KERNEL_OK")
</pallas_src>

<mosaic_0001>
module attributes {stable_mosaic.version = 11 : i64} {
  func.func @_final_kernel(%arg0: memref<16x128xf32, #tpu.memory_space<vmem>>, %arg1: memref<1x128xf32, #tpu.memory_space<vmem>>, %arg2: memref<128x128xbf16, #tpu.memory_space<vmem>>, %arg3: memref<16x128xf32, #tpu.memory_space<vmem>>, %arg4: memref<2x128xf32, #tpu.memory_space<vmem>>) attributes {dimension_semantics = [], scalar_prefetch = 0 : i64, scratch_operands = 0 : i64, tpu.core_type = #tpu.core_type<tc>} {
    %c0 = arith.constant 0 : index
    %c0_0 = arith.constant 0 : index
    %0 = vector.load %arg0[%c0, %c0_0] : memref<16x128xf32, #tpu.memory_space<vmem>>, vector<16x128xf32>
    %1 = arith.mulf %0, %0 : vector<16x128xf32>
    %cst = arith.constant dense<0.000000e+00> : vector<16xf32>
    %2 = vector.multi_reduction <add>, %1, %cst [1] : vector<16x128xf32> to vector<16xf32>
    %3 = vector.shape_cast %2 : vector<16xf32> to vector<16x1xf32>
    %cst_1 = arith.constant 1.562500e-02 : f32
    %4 = vector.broadcast %cst_1 : f32 to vector<16x1xf32>
    %5 = arith.mulf %3, %4 : vector<16x1xf32>
    %cst_2 = arith.constant 9.99999974E-6 : f32
    %6 = vector.broadcast %cst_2 : f32 to vector<16x1xf32>
    %7 = arith.addf %5, %6 : vector<16x1xf32>
    %8 = math.rsqrt %7 : vector<16x1xf32>
    %9 = vector.broadcast %8 : vector<16x1xf32> to vector<16x128xf32>
    %10 = arith.mulf %0, %9 : vector<16x128xf32>
    %c0_3 = arith.constant 0 : index
    %c0_4 = arith.constant 0 : index
    %11 = vector.load %arg1[%c0_3, %c0_4] : memref<1x128xf32, #tpu.memory_space<vmem>>, vector<1x128xf32>
    %12 = vector.broadcast %11 : vector<1x128xf32> to vector<16x128xf32>
    %13 = arith.mulf %10, %12 : vector<16x128xf32>
    %c0_5 = arith.constant 0 : index
    %c0_6 = arith.constant 0 : index
    %14 = vector.load %arg3[%c0_5, %c0_6] : memref<16x128xf32, #tpu.memory_space<vmem>>, vector<16x128xf32>
    tpu.vector_store %arg3[%c0_5, %c0_6], %13 {strides = array<i32>} : memref<16x128xf32, #tpu.memory_space<vmem>>, vector<16x128xf32>,
    %15 = vector.extract_strided_slice %13 {offsets = [7, 0], sizes = [1, 128], strides = [1, 1]} : vector<16x128xf32> to vector<1x128xf32>
    %16 = vector.extract_strided_slice %13 {offsets = [15, 0], sizes = [1, 128], strides = [1, 1]} : vector<16x128xf32> to vector<1x128xf32>
    %17 = tpu.concatenate %15, %16 in 0 : vector<1x128xf32>, vector<1x128xf32> -> vector<2x128xf32>
    %18 = arith.truncf %17 : vector<2x128xf32> to vector<2x128xbf16>
    %c0_7 = arith.constant 0 : index
    %c0_8 = arith.constant 0 : index
    %19 = vector.load %arg2[%c0_7, %c0_8] : memref<128x128xbf16, #tpu.memory_space<vmem>>, vector<128x128xbf16>
    %cst_9 = arith.constant dense<0.000000e+00> : vector<2x128xf32>
    %20 = tpu.matmul %18, %19, %cst_9 {dimension_numbers = #tpu.dot_dimension_numbers<[1], [0], [0], [1], [0, 0, 1, 1], [], []>} : vector<2x128xbf16>, vector<128x128xbf16>, vector<2x128xf32> -> vector<2x128xf32>
    %c0_10 = arith.constant 0 : index
    %c0_11 = arith.constant 0 : index
    %21 = vector.load %arg4[%c0_10, %c0_11] : memref<2x128xf32, #tpu.memory_space<vmem>>, vector<2x128xf32>
    tpu.vector_store %arg4[%c0_10, %c0_11], %20 {strides = array<i32>} : memref<2x128xf32, #tpu.memory_space<vmem>>, vector<2x128xf32>,
    return
  }
}

module attributes {stable_mosaic.version = 11 : i64} {
  func.func @_layer_kernel(%arg0: i32, %arg1: memref<1xi32, #tpu.memory_space<smem>>, %arg2: memref<8x128xf32, #tpu.memory_space<vmem>>, %arg3: memref<1x128xf32, #tpu.memory_space<vmem>>, %arg4: memref<1x128xf32, #tpu.memory_space<vmem>>, %arg5: memref<128x128xbf16, #tpu.memory_space<vmem>>, %arg6: memref<64x128xbf16, #tpu.memory_space<vmem>>, %arg7: memref<128x192xbf16, #tpu.memory_space<vmem>>, %arg8: memref<128x192xbf16, #tpu.memory_space<vmem>>, %arg9: memref<192x128xbf16, #tpu.memory_space<vmem>>, %arg10: memref<64x64xbf16, #tpu.memory_space<vmem>>, %arg11: memref<8x16xf32, #tpu.memory_space<vmem>>, %arg12: memref<8x16xf32, #tpu.memory_space<vmem>>, %arg13: memref<8x16xf32, #tpu.memory_space<vmem>>, %arg14: memref<32x64xf32, #tpu.memory_space<any>>, %arg15: memref<8x128xf32, #tpu.memory_space<vmem>>, %arg16: memref<32x64xf32, #tpu.memory_space<any>>, %arg17: memref<16x64xf32, #tpu.memory_space<vmem>>, %arg18: memref<2x!tpu.dma_semaphore, #tpu.memory_space<semaphore_mem>>) attributes {dimension_semantics = [#tpu.dimension_semantics<parallel>], iteration_bounds = array<i64: 2>, scalar_prefetch = 0 : i64, scratch_operands = 2 : i64, tpu.core_type = #tpu.core_type<tc>, window_params = [{transform_indices = @transform_0, window_bounds = array<i64: 1>}, {transform_indices = @transform_1, window_bounds = array<i64: 8, 128>}, {pipeline_mode = #tpu.pipeline_mode<synchronous>, transform_indices = @transform_2, window_bounds = array<i64: 1, 128>}, {pipeline_mode = #tpu.pipeline_mode<synchronous>, transform_indices = @transform_3, window_bounds = array<i64: 1, 128>}, {pipeline_mode = #tpu.pipeline_mode<synchronous>, transform_indices = @transform_4, window_bounds = array<i64: 128, 128>}, {pipeline_mode = #tpu.pipeline_mode<synchronous>, transform_indices = @transform_5, window_bounds = array<i64: 64, 128>}, {pipeline_mode = #tpu.pipeline_mode<synchronous>, transform_indices = @transform_6, window_bounds = array<i64: 128, 192>}, {pipeline_mode = #tpu.pipeline_mode<synchronous>, transform_indices = @transform_7, window_bounds = array<i64: 128, 192>}, {pipeline_mode = #tpu.pipeline_mode<synchronous>, transform_indices = @transform_8, window_bounds = array<i64: 192, 128>}, {pipeline_mode = #tpu.pipeline_mode<synchronous>, transform_indices = @transform_9, window_bounds = array<i64: 64, 64>}, {pipeline_mode = #tpu.pipeline_mode<synchronous>, transform_indices = @transform_10, window_bounds = array<i64: 8, 16>}, {pipeline_mode = #tpu.pipeline_mode<synchronous>, transform_indices = @transform_11, window_bounds = array<i64: 8, 16>}, {pipeline_mode = #tpu.pipeline_mode<synchronous>, transform_indices = @transform_12, window_bounds = array<i64: 8, 16>}, {}, {transform_indices = @transform_14, window_bounds = array<i64: 8, 128>}, {}]} {
    %c0 = arith.constant 0 : index
    %0 = memref.load %arg1[%c0] : memref<1xi32, #tpu.memory_space<smem>>
    %c16_i32 = arith.constant 16 : i32
    %1 = arith.muli %arg0, %c16_i32 : i32
    %c0_i32 = arith.constant 0 : i32
    %c0_i32_0 = arith.constant 0 : i32
    %2 = tpu.memref_slice %arg14[%1, %c0_i32_0] : memref<32x64xf32, #tpu.memory_space<any>> -> memref<16x64xf32, #tpu.memory_space<any>>
    %3 = tpu.memref_slice %arg18[%c0_i32] : memref<2x!tpu.dma_semaphore, #tpu.memory_space<semaphore_mem>> -> memref<1x!tpu.dma_semaphore, #tpu.memory_space<semaphore_mem>>
    %4 = tpu.memref_squeeze %3 : memref<1x!tpu.dma_semaphore, #tpu.memory_space<semaphore_mem>> -> memref<!tpu.dma_semaphore, #tpu.memory_space<semaphore_mem>>
    tpu.enqueue_dma source(%2 : memref<16x64xf32, #tpu.memory_space<any>>) target(%arg17 : memref<16x64xf32, #tpu.memory_space<vmem>>) target_semaphore(%4 : memref<!tpu.dma_semaphore, #tpu.memory_space<semaphore_mem>>)
    %c0_1 = arith.constant 0 : index
    %c0_2 = arith.constant 0 : index
    %5 = vector.load %arg2[%c0_1, %c0_2] : memref<8x128xf32, #tpu.memory_space<vmem>>, vector<8x128xf32>
    %6 = arith.mulf %5, %5 : vector<8x128xf32>
    %cst = arith.constant dense<0.000000e+00> : vector<8xf32>
    %7 = vector.multi_reduction <add>, %6, %cst [1] : vector<8x128xf32> to vector<8xf32>
    %8 = vector.shape_cast %7 : vector<8xf32> to vector<8x1xf32>
    %cst_3 = arith.constant 1.562500e-02 : f32
    %9 = vector.broadcast %cst_3 : f32 to vector<8x1xf32>
    %10 = arith.mulf %8, %9 : vector<8x1xf32>
    %cst_4 = arith.constant 9.99999974E-6 : f32
    %11 = vector.broadcast %cst_4 : f32 to vector<8x1xf32>
    %12 = arith.addf %10, %11 : vector<8x1xf32>
    %13 = math.rsqrt %12 : vector<8x1xf32>
    %14 = vector.broadcast %13 : vector<8x1xf32> to vector<8x128xf32>
    %15 = arith.mulf %5, %14 : vector<8x128xf32>
    %c0_5 = arith.constant 0 : index
    %c0_6 = arith.constant 0 : index
    %16 = vector.load %arg3[%c0_5, %c0_6] : memref<1x128xf32, #tpu.memory_space<vmem>>, vector<1x128xf32>
    %17 = vector.broadcast %16 : vector<1x128xf32> to vector<8x128xf32>
    %18 = arith.mulf %15, %17 : vector<8x128xf32>
    %19 = arith.truncf %18 : vector<8x128xf32> to vector<8x128xbf16>
    %c0_7 = arith.constant 0 : index
    %c0_8 = arith.constant 0 : index
    %20 = vector.load %arg5[%c0_7, %c0_8] : memref<128x128xbf16, #tpu.memory_space<vmem>>, vector<128x128xbf16>
    %cst_9 = arith.constant dense<0.000000e+00> : vector<8x128xf32>
    %21 = tpu.matmul %19, %20, %cst_9 {dimension_numbers = #tpu.dot_dimension_numbers<[1], [0], [0], [1], [0, 0, 1, 1], [], []>} : vector<8x128xbf16>, vector<128x128xbf16>, vector<8x128xf32> -> vector<8x128xf32>
    %22 = vector.extract_strided_slice %21 {offsets = [0, 0], sizes = [8, 64], strides = [1, 1]} : vector<8x128xf32> to vector<8x64xf32>
    %23 = vector.extract_strided_slice %21 {offsets = [0, 64], sizes = [8, 64], strides = [1, 1]} : vector<8x128xf32> to vector<8x64xf32>
    %c0_10 = arith.constant 0 : index
    %c0_11 = arith.constant 0 : index
    %24 = vector.load %arg11[%c0_10, %c0_11] : memref<8x16xf32, #tpu.memory_space<vmem>>, vector<8x16xf32>
    %c0_12 = arith.constant 0 : index
    %c0_13 = arith.constant 0 : index
    %25 = vector.load %arg12[%c0_12, %c0_13] : memref<8x16xf32, #tpu.memory_space<vmem>>, vector<8x16xf32>
    %26 = tpu.concatenate %24, %24, %24, %24 in 1 : vector<8x16xf32>, vector<8x16xf32>, vector<8x16xf32>, vector<8x16xf32> -> vector<8x64xf32>
    %27 = tpu.concatenate %25, %25, %25, %25 in 1 : vector<8x16xf32>, vector<8x16xf32>, vector<8x16xf32>, vector<8x16xf32> -> vector<8x64xf32>
    %28 = tpu.concatenate %24, %24 in 1 : vector<8x16xf32>, vector<8x16xf32> -> vector<8x32xf32>
    %cst_14 = arith.constant 1.000000e+00 : f32
    %29 = vector.broadcast %cst_14 : f32 to vector<8x32xf32>
    %30 = tpu.concatenate %28, %29 in 1 : vector<8x32xf32>, vector<8x32xf32> -> vector<8x64xf32>
    %31 = tpu.concatenate %25, %25 in 1 : vector<8x16xf32>, vector<8x16xf32> -> vector<8x32xf32>
    %cst_15 = arith.constant 0.000000e+00 : f32
    %32 = vector.broadcast %cst_15 : f32 to vector<8x32xf32>
    %33 = tpu.concatenate %31, %32 in 1 : vector<8x32xf32>, vector<8x32xf32> -> vector<8x64xf32>
    %c0_16 = arith.constant 0 : index
    %c0_17 = arith.constant 0 : index
    %34 = vector.load %arg10[%c0_16, %c0_17] : memref<64x64xbf16, #tpu.memory_space<vmem>>, vector<64x64xbf16>
    %35 = arith.truncf %22 : vector<8x64xf32> to vector<8x64xbf16>
    %cst_18 = arith.constant dense<0.000000e+00> : vector<8x64xf32>
    %36 = tpu.matmul %35, %34, %cst_18 {dimension_numbers = #tpu.dot_dimension_numbers<[1], [0], [0], [1], [0, 0, 1, 1], [], []>} : vector<8x64xbf16>, vector<64x64xbf16>, vector<8x64xf32> -> vector<8x64xf32>
    %37 = arith.truncf %23 : vector<8x64xf32> to vector<8x64xbf16>
    %cst_19 = arith.constant dense<0.000000e+00> : vector<8x64xf32>
    %38 = tpu.matmul %37, %34, %cst_19 {dimension_numbers = #tpu.dot_dimension_numbers<[1], [0], [0], [1], [0, 0, 1, 1], [], []>} : vector<8x64xbf16>, vector<64x64xbf16>, vector<8x64xf32> -> vector<8x64xf32>
    %39 = arith.mulf %22, %26 : vector<8x64xf32>
    %40 = arith.mulf %36, %27 : vector<8x64xf32>
    %41 = arith.addf %39, %40 : vector<8x64xf32>
    %42 = arith.mulf %23, %30 : vector<8x64xf32>
    %43 = arith.mulf %38, %33 : vector<8x64xf32>
    %44 = arith.addf %42, %43 : vector<8x64xf32>
    %c0_i32_20 = arith.constant 0 : i32
    %c0_i32_21 = arith.constant 0 : i32
    %45 = tpu.memref_slice %arg14[%1, %c0_i32_21] : memref<32x64xf32, #tpu.memory_space<any>> -> memref<16x64xf32, #tpu.memory_space<any>>
    %46 = tpu.memref_slice %arg18[%c0_i32_20] : memref<2x!tpu.dma_semaphore, #tpu.memory_space<semaphore_mem>> -> memref<1x!tpu.dma_semaphore, #tpu.memory_space<semaphore_mem>>
    %47 = tpu.memref_squeeze %46 : memref<1x!tpu.dma_semaphore, #tpu.memory_space<semaphore_mem>> -> memref<!tpu.dma_semaphore, #tpu.memory_space<semaphore_mem>>
    tpu.wait_dma2 semaphore(%47 : memref<!tpu.dma_semaphore, #tpu.memory_space<semaphore_mem>>) src(%45 : memref<16x64xf32, #tpu.memory_space<any>>) dst(%arg17 : memref<16x64xf32, #tpu.memory_space<vmem>>)
    %48 = arith.index_cast %0 : i32 to index
    %c0_22 = arith.constant 0 : index
    %49 = vector.load %arg17[%48, %c0_22] : memref<16x64xf32, #tpu.memory_space<vmem>>, vector<8x64xf32>
    tpu.vector_store %arg17[%48, %c0_22], %44 {strides = array<i32>} : memref<16x64xf32, #tpu.memory_space<vmem>>, vector<8x64xf32>,
    %c16_i32_23 = arith.constant 16 : i32
    %50 = arith.muli %arg0, %c16_i32_23 : i32
    %51 = arith.addi %50, %0 : i32
    %c1_i32 = arith.constant 1 : i32
    %c0_i32_24 = arith.constant 0 : i32
    %52 = tpu.memref_slice %arg17[%0, %c0_i32_24] : memref<16x64xf32, #tpu.memory_space<vmem>> -> memref<8x64xf32, #tpu.memory_space<vmem>>
    %c0_i32_25 = arith.constant 0 : i32
    %53 = tpu.memref_slice %arg16[%51, %c0_i32_25] : memref<32x64xf32, #tpu.memory_space<any>> -> memref<8x64xf32, #tpu.memory_space<any>>
    %54 = tpu.memref_slice %arg18[%c1_i32] : memref<2x!tpu.dma_semaphore, #tpu.memory_space<semaphore_mem>> -> memref<1x!tpu.dma_semaphore, #tpu.memory_space<semaphore_mem>>
    %55 = tpu.memref_squeeze %54 : memref<1x!tpu.dma_semaphore, #tpu.memory_space<semaphore_mem>> -> memref<!tpu.dma_semaphore, #tpu.memory_space<semaphore_mem>>
    tpu.enqueue_dma source(%52 : memref<8x64xf32, #tpu.memory_space<vmem>>) target(%53 : memref<8x64xf32, #tpu.memory_space<any>>) target_semaphore(%55 : memref<!tpu.dma_semaphore, #tpu.memory_space<semaphore_mem>>)
    %c0_26 = arith.constant 0 : index
    %c0_27 = arith.constant 0 : index
    %56 = vector.load %arg17[%c0_26, %c0_27] : memref<16x64xf32, #tpu.memory_space<vmem>>, vector<16x64xf32>
    %c0_28 = arith.constant 0 : index
    %c0_29 = arith.constant 0 : index
    %57 = vector.load %arg13[%c0_28, %c0_29] : memref<8x16xf32, #tpu.memory_space<vmem>>, vector<8x16xf32>
    %58 = tpu.concatenate %57, %57 in 0 : vector<8x16xf32>, vector<8x16xf32> -> vector<16x16xf32>
    %c0_30 = arith.constant 0 : index
    %c0_31 = arith.constant 0 : index
    %59 = vector.load %arg6[%c0_30, %c0_31] : memref<64x128xbf16, #tpu.memory_space<vmem>>, vector<64x128xbf16>
    %cst_32 = arith.constant 0.000000e+00 : f32
    %60 = vector.broadcast %cst_32 : f32 to vector<8x128xf32>
    %61 = vector.extract_strided_slice %41 {offsets = [0, 0], sizes = [8, 16], strides = [1, 1]} : vector<8x64xf32> to vector<8x16xf32>
    %62 = vector.extract_strided_slice %41 {offsets = [0, 16], sizes = [8, 16], strides = [1, 1]} : vector<8x64xf32> to vector<8x16xf32>
    %63 = tpu.concatenate %61, %62 in 0 : vector<8x16xf32>, vector<8x16xf32> -> vector<16x16xf32>
    %64 = vector.extract_strided_slice %56 {offsets = [0, 0], sizes = [16, 16], strides = [1, 1]} : vector<16x64xf32> to vector<16x16xf32>
    %65 = vector.extract_strided_slice %56 {offsets = [0, 32], sizes = [16, 16], strides = [1, 1]} : vector<16x64xf32> to vector<16x16xf32>
    %66 = arith.truncf %63 : vector<16x16xf32> to vector<16x16xbf16>
    %67 = arith.truncf %64 : vector<16x16xf32> to vector<16x16xbf16>
    %cst_33 = arith.constant dense<0.000000e+00> : vector<16x16xf32>
    %68 = tpu.matmul %66, %67, %cst_33 {dimension_numbers = #tpu.dot_dimension_numbers<[1], [1], [0], [0], [0, 0, 1, 0], [], []>} : vector<16x16xbf16>, vector<16x16xbf16>, vector<16x16xf32> -> vector<16x16xf32>
    %cst_34 = arith.constant 2.500000e-01 : f32
    %69 = vector.broadcast %cst_34 : f32 to vector<16x16xf32>
    %70 = arith.mulf %68, %69 : vector<16x16xf32>
    %71 = arith.addf %70, %58 : vector<16x16xf32>
    %cst_35 = arith.constant dense<0xFF800000> : vector<16xf32>
    %72 = vector.multi_reduction <maximumf>, %71, %cst_35 [1] : vector<16x16xf32> to vector<16xf32>
    %73 = vector.shape_cast %72 : vector<16xf32> to vector<16x1xf32>
    %74 = vector.broadcast %73 : vector<16x1xf32> to vector<16x16xf32>
    %75 = arith.subf %71, %74 : vector<16x16xf32>
    %76 = math.exp %75 : vector<16x16xf32>
    %cst_36 = arith.constant dense<0.000000e+00> : vector<16xf32>
    %77 = vector.multi_reduction <add>, %76, %cst_36 [1] : vector<16x16xf32> to vector<16xf32>
    %78 = vector.shape_cast %77 : vector<16xf32> to vector<16x1xf32>
    %79 = tpu.reciprocal %78 {approx = true} : vector<16x1xf32> -> vector<16x1xf32>
    %80 = vector.broadcast %79 : vector<16x1xf32> to vector<16x16xf32>
    %81 = arith.mulf %76, %80 : vector<16x16xf32>
    %82 = arith.truncf %81 : vector<16x16xf32> to vector<16x16xbf16>
    %83 = arith.truncf %65 : vector<16x16xf32> to vector<16x16xbf16>
    %cst_37 = arith.constant dense<0.000000e+00> : vector<16x16xf32>
    %84 = tpu.matmul %82, %83, %cst_37 {dimension_numbers = #tpu.dot_dimension_numbers<[1], [0], [0], [1], [0, 0, 1, 1], [], []>} : vector<16x16xbf16>, vector<16x16xbf16>, vector<16x16xf32> -> vector<16x16xf32>
    %85 = vector.extract_strided_slice %84 {offsets = [0, 0], sizes = [8, 16], strides = [1, 1]} : vector<16x16xf32> to vector<8x16xf32>
    %86 = arith.truncf %85 : vector<8x16xf32> to vector<8x16xbf16>
    %87 = vector.extract_strided_slice %59 {offsets = [0, 0], sizes = [16, 128], strides = [1, 1]} : vector<64x128xbf16> to vector<16x128xbf16>
    %cst_38 = arith.constant dense<0.000000e+00> : vector<8x128xf32>
    %88 = tpu.matmul %86, %87, %cst_38 {dimension_numbers = #tpu.dot_dimension_numbers<[1], [0], [0], [1], [0, 0, 1, 1], [], []>} : vector<8x16xbf16>, vector<16x128xbf16>, vector<8x128xf32> -> vector<8x128xf32>
    %89 = arith.addf %60, %88 : vector<8x128xf32>
    %90 = vector.extract_strided_slice %84 {offsets = [8, 0], sizes = [8, 16], strides = [1, 1]} : vector<16x16xf32> to vector<8x16xf32>
    %91 = arith.truncf %90 : vector<8x16xf32> to vector<8x16xbf16>
    %92 = vector.extract_strided_slice %59 {offsets = [16, 0], sizes = [16, 128], strides = [1, 1]} : vector<64x128xbf16> to vector<16x128xbf16>
    %cst_39 = arith.constant dense<0.000000e+00> : vector<8x128xf32>
    %93 = tpu.matmul %91, %92, %cst_39 {dimension_numbers = #tpu.dot_dimension_numbers<[1], [0], [0], [1], [0, 0, 1, 1], [], []>} : vector<8x16xbf16>, vector<16x128xbf16>, vector<8x128xf32> -> vector<8x128xf32>
    %94 = arith.addf %89, %93 : vector<8x128xf32>
    %95 = vector.extract_strided_slice %41 {offsets = [0, 32], sizes = [8, 16], strides = [1, 1]} : vector<8x64xf32> to vector<8x16xf32>
    %96 = vector.extract_strided_slice %41 {offsets = [0, 48], sizes = [8, 16], strides = [1, 1]} : vector<8x64xf32> to vector<8x16xf32>
    %97 = tpu.concatenate %95, %96 in 0 : vector<8x16xf32>, vector<8x16xf32> -> vector<16x16xf32>
    %98 = vector.extract_strided_slice %56 {offsets = [0, 16], sizes = [16, 16], strides = [1, 1]} : vector<16x64xf32> to vector<16x16xf32>
    %99 = vector.extract_strided_slice %56 {offsets = [0, 48], sizes = [16, 16], strides = [1, 1]} : vector<16x64xf32> to vector<16x16xf32>
    %100 = arith.truncf %97 : vector<16x16xf32> to vector<16x16xbf16>
    %101 = arith.truncf %98 : vector<16x16xf32> to vector<16x16xbf16>
    %cst_40 = arith.constant dense<0.000000e+00> : vector<16x16xf32>
    %102 = tpu.matmul %100, %101, %cst_40 {dimension_numbers = #tpu.dot_dimension_numbers<[1], [1], [0], [0], [0, 0, 1, 0], [], []>} : vector<16x16xbf16>, vector<16x16xbf16>, vector<16x16xf32> -> vector<16x16xf32>
    %cst_41 = arith.constant 2.500000e-01 : f32
    %103 = vector.broadcast %cst_41 : f32 to vector<16x16xf32>
    %104 = arith.mulf %102, %103 : vector<16x16xf32>
    %105 = arith.addf %104, %58 : vector<16x16xf32>
    %cst_42 = arith.constant dense<0xFF800000> : vector<16xf32>
    %106 = vector.multi_reduction <maximumf>, %105, %cst_42 [1] : vector<16x16xf32> to vector<16xf32>
    %107 = vector.shape_cast %106 : vector<16xf32> to vector<16x1xf32>
    %108 = vector.broadcast %107 : vector<16x1xf32> to vector<16x16xf32>
    %109 = arith.subf %105, %108 : vector<16x16xf32>
    %110 = math.exp %109 : vector<16x16xf32>
    %cst_43 = arith.constant dense<0.000000e+00> : vector<16xf32>
    %111 = vector.multi_reduction <add>, %110, %cst_43 [1] : vector<16x16xf32> to vector<16xf32>
    %112 = vector.shape_cast %111 : vector<16xf32> to vector<16x1xf32>
    %113 = tpu.reciprocal %112 {approx = true} : vector<16x1xf32> -> vector<16x1xf32>
    %114 = vector.broadcast %113 : vector<16x1xf32> to vector<16x16xf32>
    %115 = arith.mulf %110, %114 : vector<16x16xf32>
    %116 = arith.truncf %115 : vector<16x16xf32> to vector<16x16xbf16>
    %117 = arith.truncf %99 : vector<16x16xf32> to vector<16x16xbf16>
    %cst_44 = arith.constant dense<0.000000e+00> : vector<16x16xf32>
    %118 = tpu.matmul %116, %117, %cst_44 {dimension_numbers = #tpu.dot_dimension_numbers<[1], [0], [0], [1], [0, 0, 1, 1], [], []>} : vector<16x16xbf16>, vector<16x16xbf16>, vector<16x16xf32> -> vector<16x16xf32>
    %119 = vector.extract_strided_slice %118 {offsets = [0, 0], sizes = [8, 16], strides = [1, 1]} : vector<16x16xf32> to vector<8x16xf32>
    %120 = arith.truncf %119 : vector<8x16xf32> to vector<8x16xbf16>
    %121 = vector.extract_strided_slice %59 {offsets = [32, 0], sizes = [16, 128], strides = [1, 1]} : vector<64x128xbf16> to vector<16x128xbf16>
    %cst_45 = arith.constant dense<0.000000e+00> : vector<8x128xf32>
    %122 = tpu.matmul %120, %121, %cst_45 {dimension_numbers = #tpu.dot_dimension_numbers<[1], [0], [0], [1], [0, 0, 1, 1], [], []>} : vector<8x16xbf16>, vector<16x128xbf16>, vector<8x128xf32> -> vector<8x128xf32>
    %123 = arith.addf %94, %122 : vector<8x128xf32>
    %124 = vector.extract_strided_slice %118 {offsets = [8, 0], sizes = [8, 16], strides = [1, 1]} : vector<16x16xf32> to vector<8x16xf32>
    %125 = arith.truncf %124 : vector<8x16xf32> to vector<8x16xbf16>
    %126 = vector.extract_strided_slice %59 {offsets = [48, 0], sizes = [16, 128], strides = [1, 1]} : vector<64x128xbf16> to vector<16x128xbf16>
    %cst_46 = arith.constant dense<0.000000e+00> : vector<8x128xf32>
    %127 = tpu.matmul %125, %126, %cst_46 {dimension_numbers = #tpu.dot_dimension_numbers<[1], [0], [0], [1], [0, 0, 1, 1], [], []>} : vector<8x16xbf16>, vector<16x128xbf16>, vector<8x128xf32> -> vector<8x128xf32>
    %128 = arith.addf %123, %127 : vector<8x128xf32>
    %129 = arith.addf %5, %128 : vector<8x128xf32>
    %130 = arith.mulf %129, %129 : vector<8x128xf32>
    %cst_47 = arith.constant dense<0.000000e+00> : vector<8xf32>
    %131 = vector.multi_reduction <add>, %130, %cst_47 [1] : vector<8x128xf32> to vector<8xf32>
    %132 = vector.shape_cast %131 : vector<8xf32> to vector<8x1xf32>
    %cst_48 = arith.constant 1.562500e-02 : f32
    %133 = vector.broadcast %cst_48 : f32 to vector<8x1xf32>
    %134 = arith.mulf %132, %133 : vector<8x1xf32>
    %cst_49 = arith.constant 9.99999974E-6 : f32
    %135 = vector.broadcast %cst_49 : f32 to vector<8x1xf32>
    %136 = arith.addf %134, %135 : vector<8x1xf32>
    %137 = math.rsqrt %136 : vector<8x1xf32>
    %138 = vector.broadcast %137 : vector<8x1xf32> to vector<8x128xf32>
    %139 = arith.mulf %129, %138 : vector<8x128xf32>
    %c0_50 = arith.constant 0 : index
    %c0_51 = arith.constant 0 : index
    %140 = vector.load %arg4[%c0_50, %c0_51] : memref<1x128xf32, #tpu.memory_space<vmem>>, vector<1x128xf32>
    %141 = vector.broadcast %140 : vector<1x128xf32> to vector<8x128xf32>
    %142 = arith.mulf %139, %141 : vector<8x128xf32>
    %143 = arith.truncf %142 : vector<8x128xf32> to vector<8x128xbf16>
    %c0_52 = arith.constant 0 : index
    %c0_53 = arith.constant 0 : index
    %144 = vector.load %arg7[%c0_52, %c0_53] : memref<128x192xbf16, #tpu.memory_space<vmem>>, vector<128x192xbf16>
    %cst_54 = arith.constant dense<0.000000e+00> : vector<8x192xf32>
    %145 = tpu.matmul %143, %144, %cst_54 {dimension_numbers = #tpu.dot_dimension_numbers<[1], [0], [0], [1], [0, 0, 1, 1], [], []>} : vector<8x128xbf16>, vector<128x192xbf16>, vector<8x192xf32> -> vector<8x192xf32>
    %c0_55 = arith.constant 0 : index
    %c0_56 = arith.constant 0 : index
    %146 = vector.load %arg8[%c0_55, %c0_56] : memref<128x192xbf16, #tpu.memory_space<vmem>>, vector<128x192xbf16>
    %cst_57 = arith.constant dense<0.000000e+00> : vector<8x192xf32>
    %147 = tpu.matmul %143, %146, %cst_57 {dimension_numbers = #tpu.dot_dimension_numbers<[1], [0], [0], [1], [0, 0, 1, 1], [], []>} : vector<8x128xbf16>, vector<128x192xbf16>, vector<8x192xf32> -> vector<8x192xf32>
    %148 = arith.negf %145 : vector<8x192xf32>
    %149 = math.exp %148 : vector<8x192xf32>
    %cst_58 = arith.constant 1.000000e+00 : f32
    %150 = vector.broadcast %cst_58 : f32 to vector<8x192xf32>
    %151 = arith.addf %150, %149 : vector<8x192xf32>
    %152 = arith.divf %150, %151 : vector<8x192xf32>
    %153 = arith.mulf %145, %152 : vector<8x192xf32>
    %154 = arith.mulf %153, %147 : vector<8x192xf32>
    %155 = arith.truncf %154 : vector<8x192xf32> to vector<8x192xbf16>
    %c0_59 = arith.constant 0 : index
    %c0_60 = arith.constant 0 : index
    %156 = vector.load %arg9[%c0_59, %c0_60] : memref<192x128xbf16, #tpu.memory_space<vmem>>, vector<192x128xbf16>
    %cst_61 = arith.constant dense<0.000000e+00> : vector<8x128xf32>
    %157 = tpu.matmul %155, %156, %cst_61 {dimension_numbers = #tpu.dot_dimension_numbers<[1], [0], [0], [1], [0, 0, 1, 1], [], []>} : vector<8x192xbf16>, vector<192x128xbf16>, vector<8x128xf32> -> vector<8x128xf32>
    %158 = arith.addf %129, %157 : vector<8x128xf32>
    %c0_62 = arith.constant 0 : index
    %c0_63 = arith.constant 0 : index
    %159 = vector.load %arg15[%c0_62, %c0_63] : memref<8x128xf32, #tpu.memory_space<vmem>>, vector<8x128xf32>
    tpu.vector_store %arg15[%c0_62, %c0_63], %158 {strides = array<i32>} : memref<8x128xf32, #tpu.memory_space<vmem>>, vector<8x128xf32>,
    %c1_i32_64 = arith.constant 1 : i32
    %c0_i32_65 = arith.constant 0 : i32
    %160 = tpu.memref_slice %arg17[%0, %c0_i32_65] : memref<16x64xf32, #tpu.memory_space<vmem>> -> memref<8x64xf32, #tpu.memory_space<vmem>>
    %c0_i32_66 = arith.constant 0 : i32
    %161 = tpu.memref_slice %arg16[%51, %c0_i32_66] : memref<32x64xf32, #tpu.memory_space<any>> -> memref<8x64xf32, #tpu.memory_space<any>>
    %162 = tpu.memref_slice %arg18[%c1_i32_64] : memref<2x!tpu.dma_semaphore, #tpu.memory_space<semaphore_mem>> -> memref<1x!tpu.dma_semaphore, #tpu.memory_space<semaphore_mem>>
    %163 = tpu.memref_squeeze %162 : memref<1x!tpu.dma_semaphore, #tpu.memory_space<semaphore_mem>> -> memref<!tpu.dma_semaphore, #tpu.memory_space<semaphore_mem>>
    tpu.wait_dma2 semaphore(%163 : memref<!tpu.dma_semaphore, #tpu.memory_space<semaphore_mem>>) src(%160 : memref<8x64xf32, #tpu.memory_space<vmem>>) dst(%161 : memref<8x64xf32, #tpu.memory_space<any>>)
    return
  }
  func.func @transform_0(%arg0: i32) -> i32 {
    %c0_i32 = arith.constant 0 : i32
    %c0_i32_0 = arith.constant 0 : i32
    return %c0_i32 : i32
  }
  func.func @transform_1(%arg0: i32) -> (i32, i32) {
    %c0_i32 = arith.constant 0 : i32
    %c0_i32_0 = arith.constant 0 : i32
    return %arg0, %c0_i32 : i32, i32
  }
  func.func @transform_2(%arg0: i32) -> (i32, i32) {
    %c0_i32 = arith.constant 0 : i32
    %c0_i32_0 = arith.constant 0 : i32
    %c0_i32_1 = arith.constant 0 : i32
    return %c0_i32, %c0_i32_0 : i32, i32
  }
  func.func @transform_3(%arg0: i32) -> (i32, i32) {
    %c0_i32 = arith.constant 0 : i32
    %c0_i32_0 = arith.constant 0 : i32
    %c0_i32_1 = arith.constant 0 : i32
    return %c0_i32, %c0_i32_0 : i32, i32
  }
  func.func @transform_4(%arg0: i32) -> (i32, i32) {
    %c0_i32 = arith.constant 0 : i32
    %c0_i32_0 = arith.constant 0 : i32
    %c0_i32_1 = arith.constant 0 : i32
    return %c0_i32, %c0_i32_0 : i32, i32
  }
  func.func @transform_5(%arg0: i32) -> (i32, i32) {
    %c0_i32 = arith.constant 0 : i32
    %c0_i32_0 = arith.constant 0 : i32
    %c0_i32_1 = arith.constant 0 : i32
    return %c0_i32, %c0_i32_0 : i32, i32
  }
  func.func @transform_6(%arg0: i32) -> (i32, i32) {
    %c0_i32 = arith.constant 0 : i32
    %c0_i32_0 = arith.constant 0 : i32
    %c0_i32_1 = arith.constant 0 : i32
    return %c0_i32, %c0_i32_0 : i32, i32
  }
  func.func @transform_7(%arg0: i32) -> (i32, i32) {
    %c0_i32 = arith.constant 0 : i32
    %c0_i32_0 = arith.constant 0 : i32
    %c0_i32_1 = arith.constant 0 : i32
    return %c0_i32, %c0_i32_0 : i32, i32
  }
  func.func @transform_8(%arg0: i32) -> (i32, i32) {
    %c0_i32 = arith.constant 0 : i32
    %c0_i32_0 = arith.constant 0 : i32
    %c0_i32_1 = arith.constant 0 : i32
    return %c0_i32, %c0_i32_0 : i32, i32
  }
  func.func @transform_9(%arg0: i32) -> (i32, i32) {
    %c0_i32 = arith.constant 0 : i32
    %c0_i32_0 = arith.constant 0 : i32
    %c0_i32_1 = arith.constant 0 : i32
    return %c0_i32, %c0_i32_0 : i32, i32
  }
  func.func @transform_10(%arg0: i32) -> (i32, i32) {
    %c0_i32 = arith.constant 0 : i32
    %c0_i32_0 = arith.constant 0 : i32
    %c0_i32_1 = arith.constant 0 : i32
    return %c0_i32, %c0_i32_0 : i32, i32
  }
  func.func @transform_11(%arg0: i32) -> (i32, i32) {
    %c0_i32 = arith.constant 0 : i32
    %c0_i32_0 = arith.constant 0 : i32
    %c0_i32_1 = arith.constant 0 : i32
    return %c0_i32, %c0_i32_0 : i32, i32
  }
  func.func @transform_12(%arg0: i32) -> (i32, i32) {
    %c0_i32 = arith.constant 0 : i32
    %c0_i32_0 = arith.constant 0 : i32
    %c0_i32_1 = arith.constant 0 : i32
    return %c0_i32, %c0_i32_0 : i32, i32
  }
  func.func @transform_14(%arg0: i32) -> (i32, i32) {
    %c0_i32 = arith.constant 0 : i32
    %c0_i32_0 = arith.constant 0 : i32
    return %arg0, %c0_i32 : i32, i32
  }
}

</mosaic_0001>

<bundles_post_ra>
// kernel: transformer_forward.5
= control target key start
LH: loop header
LB: loop body
LE: loop exit
PB: predicated region body
PF: predicated region fallthrough
CT: control target
= control target key end

     0   :  { %10 = vsyncpa [#allocation3], 0  ;;  %v294_v3 = vmov 0.0   ;;  %s382_s0 = inlined_call_operand.vmem [shape: f32[16,128], index: 0, kind: input, shape index: {}]   ;;  %s383_s1 = inlined_call_operand.vmem [shape: f32[1,128], index: 1, kind: input, shape index: {}]   ;;  %s384_s2 = inlined_call_operand.vmem [shape: bf16[128,128], index: 2, kind: input, shape index: {}]   ;;  %s385_s3 = inlined_call_operand.hbm [shape: f32[16,128], index: 3, kind: output, shape index: {0}]   ;;  %s386_s4 = inlined_call_operand.hbm [shape: f32[2,128], index: 4, kind: output, shape index: {1}]  }
   0x1   :  { %v19_v0 = vld [vmem:[%s382_s0] sm:$0xff]  ;;  %v20_v1 = vld [vmem:[%s382_s0 + $0x8] sm:$0xff]  ;;  %208 = vmatprep.subr.bf16.mxu0 %v294_v3 }
   0x2   :  { %v21_v2 = vmul.f32 %v19_v0, %v19_v0  ;;  %v234_v4 = vld [vmem:[%s384_s2] sm:$0xff]   ;;  %v22_v5 = vmul.f32 %v20_v1, %v20_v1 }
   0x3   :  { %209 = vmatpush3.bf16.msra.mxu0 %v234_v4 }
   0x4   :  { %23 = vadd.xlane.f32.xlu0 %v21_v2  ;;  %210 = vmatprep.subr.bf16.mxu0 %v294_v3 }
   0x5   :  { %11 = vsyncpa [#allocation5], 0  ;;  %v235_v6 = vld [vmem:[%s384_s2 + $0x8] sm:$0xff]   ;;  %v236_v7 = vld [vmem:[%s384_s2 + $0x10] sm:$0xff]   ;;  %vm295_vm0 = vmmov 0   ;;  %vm52_vm1 = vcmask 1040384  }
   0x6   :  { %v237_v8 = vld [vmem:[%s384_s2 + $0x18] sm:$0xff]   ;;  %v238_v9 = vld [vmem:[%s384_s2 + $0x20] sm:$0xff]   ;;  %v239_v10 = vld [vmem:[%s384_s2 + $0x28] sm:$0xff]   ;;  %224 = vmatprep.mubr.msk.bf16.mxu0 %vm295_vm0, %v294_v3 }
   0x7   :  { %211 = vmatpush3.bf16.msra.mxu0 %v235_v6  ;;  %v240_v11 = vld [vmem:[%s384_s2 + $0x30] sm:$0xff]   ;;  %v241_v12 = vld [vmem:[%s384_s2 + $0x38] sm:$0xff]   ;;  %v190_v20 = vld [vmem:[%s383_s1] ss:$0 sm:$0xff]  ;;  %s296_s2 = smov [#allocation2]  }
   0x8   :  { %25 = vadd.xlane.f32.xlu0 %v22_v5  ;;  %212 = vmatprep.subr.bf16.mxu0 %v294_v3  ;;  %s165_s10 = sshll.u32 %s296_s2, 4  ;;  %s166_s10 = int_to_ptr.vmem [resolvable:$true] %s165_s10 }
   0x9   :  { %s246_s11 = scalar_lea.vmem %s166_s10, 256  ;;  %p251_p1 = scmp.lt.s32.totalorder %s166_s10, %s166_s10 }
   0xa   :  { %p247_p0 = scmp.ne.s32.totalorder %s166_s10, %s246_s11  ;;  %p252_p2 = scmp.lt.s32.totalorder %s246_s11, %s246_s11 }
   0xb   :  { %213 = vmatpush3.bf16.msra.mxu0 %v236_v7 }
   0xc   :  { %214 = vmatprep.subr.bf16.mxu0 %v294_v3  ;;  %p253_p3 = por %p252_p2, %p251_p1 }
   0xe   :  { %p254_p4 = pnand %p253_p3, %p247_p0 }
   0xf   :  { %215 = vmatpush3.bf16.msra.mxu0 %v237_v8 }
  0x10   :  { %216 = vmatprep.subr.bf16.mxu0 %v294_v3 }
  0x13   :  { %217 = vmatpush3.bf16.msra.mxu0 %v238_v9 }
  0x14   :  { %218 = vmatprep.subr.bf16.mxu0 %v294_v3 }
  0x17   :  { %219 = vmatpush3.bf16.msra.mxu0 %v239_v10 }
  0x18   :  { %220 = vmatprep.subr.bf16.mxu0 %v294_v3 }
  0x1b   :  { %221 = vmatpush3.bf16.msra.mxu0 %v240_v11 }
  0x1c   :  { %222 = vmatprep.subr.bf16.mxu0 %v294_v3 }
  0x1f   :  { %223 = vmatpush3.bf16.msra.mxu0 %v241_v12 }
  0x91   :  { %v24_v13 = vpop.xlane.xlu0 %23 }
  0x92   :  { %v27_v14 = vmul.f32 0.015625, %v24_v13 }
  0x94   :  { %v29_v15 = vadd.f32 1e-05, %v27_v14 }
  0x95   :  { %v26_v16 = vpop.xlane.xlu0 %25 }
  0x96   :  { %242 = vrsqrt.f32 %v29_v15  ;;  %v28_v17 = vmul.f32 0.015625, %v26_v16 }
  0x98   :  { %v30_v18 = vadd.f32 1e-05, %v28_v17 }
  0x9a   :  { %244 = vrsqrt.f32 %v30_v18 }
  0xa0   :  { %v243_v19 = vpop.eup %242 }
  0xa1   :  { %v33_v21 = vmul.f32 %v243_v19, %v19_v0 }
  0xa3   :  { %v42_v22 = vmul.f32 %v190_v20, %v33_v21 }
  0xa4   :  { %v245_v23 = vpop.eup %244 }
  0xa5   :  { %v34_v24 = vmul.f32 %v245_v23, %v20_v1  ;;  %44 = vst [vmem:[#allocation2] sm:$0xff] %v42_v22  ;;  %v47_v26 = vrot.slane %v42_v22, 7 }
  0xa7   :  { %v43_v25 = vmul.f32 %v190_v20, %v34_v24 }
  0xa9   :  { %v50_v27 = vrot.slane %v43_v25, 6  ;;  %45 = vst [vmem:[#allocation2 + $0x8] sm:$0xff] %v43_v25 }
  0xab   :  { %v53_v28 = vsel %vm52_vm1, %v47_v26, %v50_v27 }
  0xac   :  { %v54_v29 = vpack.c.bf16 %v53_v28, %v53_v28 }
  0xae   :  { %225 = vmatmul.mubr.bf16.vlgmr.msra.gmra.mrb[0].mxu0 %v54_v29 }
  0xaf   :  { %257 = shalt.err (!%p254_p4)
}
  0xb0   :  { %s258_s13 = scalar_lea.hbm %s385_s3, 256 }
  0xb1   :  { %p259_p5 = scmp.ne.s32.totalorder %s385_s3, %s258_s13  ;;  %p262_p6 = scmp.lt.u32.totalorder %s258_s13, %s385_s3 }
  0xb3   :  { %p264_p7 = pnand %p262_p6, %p259_p5 }
  0xb5   :  { %267 = shalt.err (!%p264_p7)
}
  0xb6   :  { %s297_s18 = smov 128   ;;  %s298_s19 = smov 8  }
  0xb7   :  { %171 = dma.vmem_to_hbm [thread:$0]  %s166_s10, 256, %s385_s3, [#allocation3], %s297_s18, %s297_s18, %s298_s19  }
  0xb8   :  { %s299_s22 = smov [#allocation4]  }
  0xb9   :  { %s178_s0 = sshll.u32 %s299_s22, 4  ;;  %s179_s0 = int_to_ptr.vmem [resolvable:$true] %s178_s0 }
  0xba   :  { %s268_s23 = scalar_lea.vmem %s179_s0, 32  ;;  %p273_p9 = scmp.lt.s32.totalorder %s179_s0, %s179_s0 }
  0xbb   :  { %p269_p8 = scmp.ne.s32.totalorder %s179_s0, %s268_s23  ;;  %p274_p10 = scmp.lt.s32.totalorder %s268_s23, %s268_s23 }
  0xbd   :  { %p275_p11 = por %p274_p10, %p273_p9 }
  0xbf   :  { %p276_p12 = pnand %p275_p11, %p269_p8 }
 0x181   :  { %v153_v30 = vpop.f32.mrb[0].mxu0 }
 0x182   :  { %159 = vst [vmem:[#allocation4] sm:$0x3] %v153_v30  ;;  %v226_v31 = vpop.f32.mrb[1].mxu0 }
 0x183   :  { %v156_v32 = vpop.f32.mrb[2].mxu0 }
 0x184   :  { %279 = shalt.err (!%p276_p12)
}
 0x185   :  { %s280_s26 = scalar_lea.hbm %s386_s4, 32 }
 0x186   :  { %p281_p13 = scmp.ne.s32.totalorder %s386_s4, %s280_s26  ;;  %p284_p0 = scmp.lt.u32.totalorder %s280_s26, %s386_s4 }
 0x188   :  { %p286_p1 = pnand %p284_p0, %p281_p13 }
 0x18a   :  { %289 = shalt.err (!%p286_p1)
}
 0x18b   :  { %181 = dma.vmem_to_hbm [thread:$0]  %s179_s0, 32, %s386_s4, [#allocation5]   ;;  %v227_v33 = vpop.f32.mrb[3].mxu0 }
 0x18c   :  { %290 = dma.done.wait [#allocation3], 256  }
 0x18d   :  { %291 = vsyncadd [#allocation3], 4294967040 }
 0x18e   :  { %292 = dma.done.wait [#allocation5], 32  }
 0x18f   :  { %293 = vsyncadd [#allocation5], 4294967264 }
 0x190   :  { %188 = vsyncpa [#allocation3], 1 }
 0x191   :  { %189 = vsyncpa [#allocation5], 1 }

// kernel: transformer_forward.3
= control target key start
LH: loop header
LB: loop body
LE: loop exit
PB: predicated region body
PF: predicated region fallthrough
CT: control target
= control target key end

     0   :  { %s2282_s20 = smov 0   ;;  %s2631_s0 = inlined_call_operand.<no memory space> [shape: s32[1], index: 0, kind: input, shape index: {}]   ;;  %s2632_s1 = inlined_call_operand.vmem [shape: f32[16,128], index: 1, kind: input, shape index: {}]   ;;  %s2633_s2 = inlined_call_operand.vmem [shape: f32[1,128], index: 2, kind: input, shape index: {}]   ;;  %s2634_s3 = inlined_call_operand.vmem [shape: f32[1,128], index: 3, kind: input, shape index: {}]   ;;  %s2635_s4 = inlined_call_operand.vmem [shape: bf16[128,128], index: 4, kind: input, shape index: {}]   ;;  %s2636_s5 = inlined_call_operand.vmem [shape: bf16[64,128], index: 5, kind: input, shape index: {}]   ;;  %s2637_s6 = inlined_call_operand.vmem [shape: bf16[128,192], index: 6, kind: input, shape index: {}]   ;;  %s2638_s7 = inlined_call_operand.vmem [shape: bf16[128,192], index: 7, kind: input, shape index: {}]   ;;  %s2639_s8 = inlined_call_operand.vmem [shape: bf16[192,128], index: 8, kind: input, shape index: {}]   ;;  %s2640_s9 = inlined_call_operand.vmem [shape: bf16[64,64], index: 9, kind: input, shape index: {}]   ;;  %s2641_s10 = inlined_call_operand.vmem [shape: f32[8,16], index: 10, kind: input, shape index: {}]   ;;  %s2642_s11 = inlined_call_operand.vmem [shape: f32[8,16], index: 11, kind: input, shape index: {}]   ;;  %s2643_s12 = inlined_call_operand.vmem [shape: f32[8,16], index: 12, kind: input, shape index: {}]   ;;  %s2644_s13 = inlined_call_operand.vmem [shape: f32[32,64], index: 13, kind: input, shape index: {}, may-alias: {13,15}]   ;;  %s2645_s14 = inlined_call_operand.vmem [shape: f32[16,128], index: 14, kind: output, shape index: {0}]   ;;  %s2646_s15 = inlined_call_operand.vmem [shape: f32[32,64], index: 15, kind: output, shape index: {1}, may-alias: {13,15}]  }
   0x1   :  { %21 = sst [smem:[#allocation4]] %s2631_s0 }
   0x2 LB: > { %s2288_s21 = sadd.s32 4294967295, %s2187_s20   ;;  %p1845_p0 = scmp.ge.s32.totalorder %s2187_s20, 1  ;;  %s2187_s20 = sphi %s2282_s20, %s27_s20  }
   0x3   : > { %p390_p1 = scmp.lt.s32.totalorder %s2187_s20, 3 }
   0x5   : > { %p391_p2 = pnand %p1845_p0, %p390_p1 }
   0x6   : > { %p432_p3 = scmp.lt.s32.totalorder (!%p391_p2), %s2288_s21, 1  ;;  %s2293_s0 = sld [smem:[#allocation4]] (!%p391_p2) }
   0x7   : > { %394 = sbr.rel (%p391_p2) target bundleno = 3442 (0xd72), region = 72  ;;  %s1848_s22 = sshll.u32 (!%p391_p2), %s2288_s21, 4 }
   0x8   : > { %s443_s26 = scalar_lea.vmem (!%p391_p2), %s2644_s13, %s1848_s22 }
   0x9   : > { %v476_v0 = vld [vmem:[%s443_s26] sm:$0xff] (!%p391_p2)  ;;  %v478_v1 = vld [vmem:[%s443_s26 + $0x8] sm:$0xff] (!%p391_p2) }
   0xa   : > { %477 = vst [vmem:[#allocation2] sm:$0xff] (!%p391_p2), %v476_v0  ;;  %479 = vst [vmem:[#allocation2 + $0x8] sm:$0xff] (!%p391_p2), %v478_v1 }
   0xe   : > { %s433_s23 = scalar_select %p432_p3, %s2288_s21, 1 }
  0x10   : > { %s1846_s27 = sshll.u32 %s433_s23, 3 }
  0x11   : > { %s435_s30 = scalar_lea.vmem %s2632_s1, %s1846_s27  ;;  %s2308_s18 = scalar_lea.vmem %s2645_s14, %s1846_s27 }
  0x12   : > { %v2310_v2 = vld [vmem:[%s435_s30] sm:$0xff] }
  0x13   : > { %487 = vsyncadd [#allocation3], 256  ;;  %v489_v3 = vmul.f32 %v2310_v2, %v2310_v2  ;;  %v2189_v4 = vmov 0.0   ;;  %v2073_v5 = vld [vmem:[%s2635_s4] sm:$0xff]   ;;  %v2074_v6 = vld [vmem:[%s2635_s4 + $0x8] sm:$0xff]   ;;  %s2190_s17 = smov 16  }
  0x14   : > { %1963 = vmatprep.subr.bf16.mxu1 %v2189_v4  ;;  %v2075_v7 = vld [vmem:[%s2635_s4 + $0x10] sm:$0xff]   ;;  %v609_v8 = vld [vmem:[%s2641_s10] sm:$0xff]  ;;  %v2076_v9 = vld [vmem:[%s2635_s4 + $0x18] sm:$0xff]   ;;  %vm2191_vm0 = vmmov 0   ;;  %s2192_s19 = smov 32   ;;  %s2193_s23 = smov 48  }
  0x15   : > { %490 = vadd.xlane.f32.xlu0 %v489_v3  ;;  %1964 = vmatpush3.bf16.msra.mxu1 %v2073_v5  ;;  %v2077_v10 = vld [vmem:[%s2635_s4 + $0x20] sm:$0xff]   ;;  %v2078_v11 = vld [vmem:[%s2635_s4 + $0x28] sm:$0xff]   ;;  %v2079_v12 = vld [vmem:[%s2635_s4 + $0x30] sm:$0xff]   ;;  %vm621_vm1 = vcmask 130048   ;;  %vm623_vm2 = vcmask 261120   ;;  %s2194_s24 = smov 64  }
  0x16   : > { %1965 = vmatprep.subr.bf16.mxu1 %v2189_v4  ;;  %612 = vrot.lane.b32.xlu1 %v609_v8, %s2190_s17  ;;  %v2080_v13 = vld [vmem:[%s2635_s4 + $0x38] sm:$0xff]   ;;  %v2355_v14 = vld [vmem:[%s2642_s11] sm:$0xff]  ;;  %v2082_v27 = vld [vmem:[%s2640_s9 + $0x8] sm:$0xff]   ;;  %vm625_vm3 = vcmask 392192   ;;  %vm675_vm4 = vcmask 523264  }
  0x17   : > { %1979 = vmatprep.mubr.msk.bf16.mxu1 %vm2191_vm0, %v2189_v4  ;;  %v1849_v22 = vld [vmem:[%s2633_s2] ss:$0 sm:$0xff]  ;;  %v2083_v28 = vld [vmem:[%s2640_s9 + $0x10] sm:$0xff]   ;;  %v2084_v29 = vld [vmem:[%s2640_s9 + $0x18] sm:$0xff]  }
  0x18   : > { %v2081_v25 = vld [vmem:[%s2640_s9] sm:$0xff]  }
  0x19   : > { %1966 = vmatpush3.bf16.msra.mxu1 %v2074_v6 }
  0x1a   : > { %1967 = vmatprep.subr.bf16.mxu1 %v2189_v4  ;;  %628 = vrot.lane.b32.xlu1 %v2355_v14, %s2190_s17 }
  0x1d   : > { %1968 = vmatpush3.bf16.msra.mxu1 %v2075_v7 }
  0x1e   : > { %1969 = vmatprep.subr.bf16.mxu1 %v2189_v4  ;;  %615 = vrot.lane.b32.xlu1 %v609_v8, %s2192_s19 }
  0x21   : > { %1970 = vmatpush3.bf16.msra.mxu1 %v2076_v9 }
  0x22   : > { %1971 = vmatprep.subr.bf16.mxu1 %v2189_v4  ;;  %631 = vrot.lane.b32.xlu1 %v2355_v14, %s2192_s19 }
  0x25   : > { %1972 = vmatpush3.bf16.msra.mxu1 %v2077_v10 }
  0x26   : > { %1973 = vmatprep.subr.bf16.mxu1 %v2189_v4  ;;  %618 = vrot.lane.b32.xlu1 %v609_v8, %s2193_s23 }
  0x29   : > { %1974 = vmatpush3.bf16.msra.mxu1 %v2078_v11 }
  0x2a   : > { %1975 = vmatprep.subr.bf16.mxu1 %v2189_v4  ;;  %634 = vrot.lane.b32.xlu1 %v2355_v14, %s2193_s23 }
  0x2d   : > { %1976 = vmatpush3.bf16.msra.mxu1 %v2079_v12 }
  0x2e   : > { %1977 = vmatprep.subr.bf16.mxu1 %v2189_v4 }
  0x31   : > { %1978 = vmatpush3.bf16.msra.mxu1 %v2080_v13 }
  0x32   : > { %1983 = vmatprep.subr.bf16.mxu1 %v2189_v4 }
  0x88   : > { %v613_v15 = vpop.permute.xlu1 %612 }
  0x89   : > { %v622_v16 = vsel %vm621_vm1, %v609_v8, %v613_v15 }
  0x8a   : > { %v640_v17 = vsel %vm623_vm2, %v622_v16, 1.0 }
  0x8b   : > { %769 = vrot.lane.b32.xlu1 %v640_v17, %s2194_s24 }
  0x8c   : > { %v629_v30 = vpop.permute.xlu1 %628 }
  0x8d   : > { %v637_v43 = vsel %vm621_vm1, %v2355_v14, %v629_v30 }
  0x8e   : > { %v641_v53 = vsel %vm623_vm2, %v637_v43, 0.0 }
  0x90   : > { %v616_v31 = vpop.permute.xlu1 %615 }
  0x91   : > { %v624_v33 = vsel %vm623_vm2, %v622_v16, %v616_v31 }
  0x94   : > { %v632_v32 = vpop.permute.xlu1 %631 }
  0x95   : > { %v638_v44 = vsel %vm623_vm2, %v637_v43, %v632_v32 }
  0x98   : > { %v619_v34 = vpop.permute.xlu1 %618 }
  0x99   : > { %v626_v35 = vsel %vm625_vm3, %v624_v33, %v619_v34 }
  0x9c   : > { %v635_v45 = vpop.permute.xlu1 %634 }
  0x9d   : > { %v639_v46 = vsel %vm625_vm3, %v638_v44, %v635_v45 }
  0xa2   : > { %v491_v18 = vpop.xlane.xlu0 %490 }
  0xa3   : > { %v492_v19 = vmul.f32 0.015625, %v491_v18 }
  0xa5   : > { %v493_v20 = vadd.f32 1e-05, %v492_v19 }
  0xa7   : > { %2085 = vrsqrt.f32 %v493_v20 }
  0xb1   : > { %v2086_v21 = vpop.eup %2085 }
  0xb2   : > { %v495_v23 = vmul.f32 %v2086_v21, %v2310_v2 }
  0xb4   : > { %v503_v24 = vmul.f32 %v1849_v22, %v495_v23 }
  0xb6   : > { %v504_v26 = vpack.c.bf16 %v503_v24, %v503_v24 }
  0xb8   : > { %1980 = vmatmul.mubr.bf16.vlgmr.msra.gmra.mrb[0].mxu1 %v504_v26 }
  0xb9   : > { %1984 = vmatpush3.bf16.msra.mxu1 %v2081_v25  ;;  %1991 = vmatprep.mubr.msk.bf16.mxu1 %vm2191_vm0, %v2189_v4 }
  0xba   : > { %1985 = vmatprep.subr.bf16.mxu1 %v2189_v4 }
  0xbd   : > { %1986 = vmatpush3.bf16.msra.mxu1 %v2082_v27 }
  0xbe   : > { %1987 = vmatprep.subr.bf16.mxu1 %v2189_v4 }
  0xc1   : > { %1988 = vmatpush3.bf16.msra.mxu1 %v2083_v28 }
  0xc2   : > { %1989 = vmatprep.subr.bf16.mxu1 %v2189_v4 }
  0xc5   : > { %1990 = vmatpush3.bf16.msra.mxu1 %v2084_v29 }
  0xc6   : > { %1995 = vmatprep.subr.bf16.mxu1 %v2189_v4 }
  0xfd   : > { %v770_v59 = vpop.permute.xlu1 %769 }
 0x18b   : > { %v603_v36 = vpop.f32.mrb[0].mxu1 }
 0x18c   : > { %v650_v37 = vpack.c.bf16 %v603_v36, %v603_v36  ;;  %v765_v38 = vmul.f32 %v626_v35, %v603_v36  ;;  %v1981_v39 = vpop.f32.mrb[1].mxu1  ;;  %v772_v60 = vmul.f32 %v770_v59, %v603_v36 }
 0x18d   : > { %v606_v40 = vpop.f32.mrb[2].mxu1 }
 0x18e   : > { %720 = vrot.lane.b32.xlu0 %v650_v37, %s2194_s24  ;;  %v1982_v41 = vpop.f32.mrb[3].mxu1  ;;  %1992 = vmatmul.mubr.msk.bf16.vlgmr.msra.gmra.mrb[4].mxu1 %vm675_vm4, %v650_v37 }
 0x18f   : > { %1996 = vmatpush3.bf16.msra.mxu1 %v2081_v25  ;;  %2003 = vmatprep.mubr.msk.bf16.mxu1 %vm2191_vm0, %v2189_v4 }
 0x190   : > { %1997 = vmatprep.subr.bf16.mxu1 %v2189_v4 }
 0x193   : > { %1998 = vmatpush3.bf16.msra.mxu1 %v2082_v27 }
 0x194   : > { %1999 = vmatprep.subr.bf16.mxu1 %v2189_v4 }
 0x197   : > { %2000 = vmatpush3.bf16.msra.mxu1 %v2083_v28 }
 0x198   : > { %2001 = vmatprep.subr.bf16.mxu1 %v2189_v4 }
 0x19b   : > { %2002 = vmatpush3.bf16.msra.mxu1 %v2084_v29 }
 0x200   : > { %v721_v42 = vpop.permute.xlu0 %720 }
 0x201   : > { %2004 = vmatmul.mubr.msk.bf16.vlgmr.msra.gmra.mrb[8].mxu1 %vm675_vm4, %v721_v42 }
 0x261   : > { %v713_v47 = vpop.f32.mrb[4].mxu1 }
 0x262   : > { %v766_v48 = vmul.f32 %v713_v47, %v639_v46  ;;  %v1993_v49 = vpop.f32.mrb[5].mxu1 }
 0x263   : > { %v716_v50 = vpop.f32.mrb[6].mxu1 }
 0x264   : > { %v767_v51 = vadd.f32 %v766_v48, %v765_v38  ;;  %v1994_v52 = vpop.f32.mrb[7].mxu1 }
 0x2d4   : > { %v759_v54 = vpop.f32.mrb[8].mxu1 }
 0x2d5   : > { %v773_v55 = vmul.f32 %v759_v54, %v641_v53  ;;  %v2005_v56 = vpop.f32.mrb[9].mxu1 }
 0x2d6   : > { %v762_v57 = vpop.f32.mrb[10].mxu1 }
 0x2d7   : > { %775 = vrot.lane.b32.xlu0 %v773_v55, %s2194_s24  ;;  %v2006_v58 = vpop.f32.mrb[11].mxu1 }
 0x349   : > { %v776_v61 = vpop.permute.xlu0 %775 }
 0x34a   : > { %v778_v62 = vadd.f32 %v776_v61, %v772_v60 }
 0x34c   : > { %783 = vrot.lane.b32.xlu0 %v778_v62, %s2194_s24 }
 0x34d   : > { %2181 = dma.done.wait [#allocation3], 256 }
 0x34e   : > { %2182 = vsyncadd [#allocation3], 4294967040  ;;  %s786_s17 = scalar_lea.vmem [#allocation2], %s2293_s0  ;;  %s788_s25 = sadd.s32 %s1848_s22, %s2293_s0 }
 0x34f   : > { %s789_s28 = scalar_lea.vmem %s2646_s15, %s788_s25 }
 0x3be   : > { %v784_v63 = vpop.permute.xlu0 %783 }
 0x3bf   : > { %787 = vst.msk [vmem:[%s786_s17] sm:$0xff] %vm675_vm4, %v784_v63 }
 0x3c6   : > { %v823_v0 = vld [vmem:[%s786_s17] sm:$0xff] }
 0x3c7   : > { %824 = vst [vmem:[%s789_s28] sm:$0xff] %v823_v0 }
 0x3c8   : > { %832 = vsyncadd [#allocation3 + $0x1], 128  ;;  %2007 = vmatprep.subr.bf16.mxu0 %v2189_v4  ;;  %v833_v1 = vld [vmem:[#allocation2] sm:$0xff]  ;;  %v834_v3 = vld [vmem:[#allocation2 + $0x8] sm:$0xff]  ;;  %2009 = vmatprep.mubr.msk.bf16.mxu0 %vm2191_vm0, %v2189_v4  ;;  %s2195_s24 = smov 112   ;;  %s2196_s22 = smov 96  }
 0x3c9   : > { %845 = vrot.lane.b32.xlu0 %v767_v51, %s2195_s24  ;;  %v2414_v5 = vpack.c.bf16 %v834_v3, %v833_v1  ;;  %2025 = vmatprep.subr.bf16.mxu1 %v2189_v4  ;;  %v2428_v10 = vld [vmem:[%s2643_s12] sm:$0xff]  ;;  %v2087_v37 = vld [vmem:[%s2636_s5 + $0x8] sm:$0xff]   ;;  %s2197_s23 = smov 80  }
 0x3ca   : > { %2027 = vmatprep.mubr.msk.bf16.mxu1 %vm2191_vm0, %v2189_v4  ;;  %v2088_v39 = vld [vmem:[%s2636_s5] sm:$0xff]  }
 0x3cb   : > { %v854_v6 = vsel %vm621_vm1, %v2414_v5, 0  ;;  %2026 = vmatpush3.bf16.msra.mxu1 %v2088_v39  ;;  %v2105_v39 = vld [vmem:[%s2637_s6 + $0x24] ss:$8 sps:$4 sm:$0xff]  }
 0x3cc   : > { %2008 = vmatpush3.bf16.xpose.msra.mxu0 %v854_v6  ;;  %2037 = vmatprep.subr.bf16.mxu1 %v2189_v4 }
 0x3cd   : > { %2013 = vmatprep.subr.bf16.mxu0 %v2189_v4 }
 0x43b   : > { %v846_v7 = vpop.permute.xlu0 %845 }
 0x43c   : > { %v848_v8 = vpack.c.bf16 %v846_v7, %v767_v51 }
 0x43e   : > { %2010 = vmatmul.mubr.msk.bf16.vlgmr.msra.gmra.mrb[0].mxu0 %vm621_vm1, %v848_v8 }
 0x43f   : > { %2015 = vmatprep.mubr.msk.bf16.mxu0 %vm2191_vm0, %v2189_v4 }
 0x511   : > { %v890_v9 = vpop.f32.mrb[0].mxu0 }
 0x512   : > { %v897_v11 = vmul.f32 0.25, %v890_v9  ;;  %v2011_v12 = vpop.f32.mrb[1].mxu0 }
 0x513   : > { %v893_v13 = vpop.f32.mrb[2].mxu0 }
 0x514   : > { %v898_v14 = vmul.f32 0.25, %v893_v13  ;;  %v2012_v15 = vpop.f32.mrb[3].mxu0  ;;  %v899_v16 = vadd.f32 %v897_v11, %v2428_v10 }
 0x516   : > { %v901_v17 = vsel %vm621_vm1, %v899_v16, -inf  ;;  %v900_v18 = vadd.f32 %v898_v14, %v2428_v10 }
 0x517   : > { %902 = vmax.xlane.f32.xlu0 %v901_v17 }
 0x518   : > { %v904_v19 = vsel %vm621_vm1, %v900_v18, -inf }
 0x519   : > { %905 = vmax.xlane.f32.xlu1 %v904_v19 }
 0x5a4   : > { %v903_v20 = vpop.xlane.xlu0 %902 }
 0x5a5   : > { %v907_v21 = vsub.f32 %v899_v16, %v903_v20 }
 0x5a6   : > { %v906_v22 = vpop.xlane.xlu1 %905 }
 0x5a7   : > { %v909_v23 = vmul.f32 1.442695, %v907_v21  ;;  %v908_v24 = vsub.f32 %v900_v18, %v906_v22 }
 0x5a9   : > { %2151 = vpow2.f32 %v909_v23  ;;  %v911_v25 = vmul.f32 1.442695, %v908_v24 }
 0x5ab   : > { %2153 = vpow2.f32 %v911_v25 }
 0x5b3   : > { %v2152_v26 = vpop.eup %2151 }
 0x5b4   : > { %v913_v27 = vsel %vm621_vm1, %v2152_v26, 0.0 }
 0x5b5   : > { %v2154_v28 = vpop.eup %2153  ;;  %914 = vadd.xlane.f32.xlu1 %v913_v27 }
 0x5b6   : > { %v916_v29 = vsel %vm621_vm1, %v2154_v28, 0.0 }
 0x5b9   : > { %917 = vadd.xlane.f32.xlu1 %v916_v29 }
 0x5ca   : > { %925 = vrot.lane.b32.xlu1 %v2414_v5, %s2196_s22 }
 0x5ce   : > { %1075 = vrot.lane.b32.xlu1 %v2414_v5, %s2195_s24 }
 0x5d2   : > { %1073 = vrot.lane.b32.xlu1 %v848_v8, %s2196_s22 }
 0x642   : > { %v915_v30 = vpop.xlane.xlu1 %914 }
 0x643   : > { %2155 = vrcp.f32 %v915_v30 }
 0x646   : > { %v918_v31 = vpop.xlane.xlu1 %917 }
 0x647   : > { %2157 = vrcp.f32 %v918_v31 }
 0x64a   : > { %v926_v32 = vpop.permute.xlu1 %925 }
 0x64b   : > { %2014 = vmatpush3.bf16.msra.mxu0 %v926_v32  ;;  %v2091_v32 = vld [vmem:[%s2637_s6] ss:$8 sps:$4 sm:$0xff]  }
 0x64c   : > { %2019 = vmatprep.subr.bf16.mxu0 %v2189_v4 }
 0x64d   : > { %v2156_v33 = vpop.eup %2155 }
 0x64e   : > { %v921_v35 = vmul.f32 %v2156_v33, %v2152_v26  ;;  %v1076_v43 = vpop.permute.xlu1 %1075  ;;  %v2093_v33 = vld [vmem:[%s2637_s6 + $0x4] ss:$8 sps:$4 sm:$0xff]  }
 0x64f   : > { %v1081_v45 = vsel %vm621_vm1, %v1076_v43, 0 }
 0x651   : > { %v2158_v34 = vpop.eup %2157 }
 0x652   : > { %v922_v36 = vmul.f32 %v2158_v34, %v2154_v28  ;;  %v1074_v48 = vpop.permute.xlu1 %1073  ;;  %v2096_v34 = vld [vmem:[%s2638_s7 + $0x4] ss:$8 sps:$4 sm:$0xff]  }
 0x654   : > { %v923_v38 = vpack.c.bf16 %v922_v36, %v921_v35  ;;  %v2099_v35 = vld [vmem:[%s2637_s6 + $0x14] ss:$8 sps:$4 sm:$0xff]  }
 0x655   : > { %v2102_v36 = vld [vmem:[%s2638_s7 + $0x14] ss:$8 sps:$4 sm:$0xff]  }
 0x656   : > { %2016 = vmatmul.mubr.msk.bf16.vlgmr.msra.gmra.mrb[4].mxu0 %vm621_vm1, %v923_v38  ;;  %v2100_v38 = vld [vmem:[%s2638_s7 + $0x10] ss:$8 sps:$4 sm:$0xff]  }
 0x657   : > { %2020 = vmatpush3.bf16.msra.mxu0 %v2087_v37  ;;  %2021 = vmatprep.mubr.msk.bf16.mxu0 %vm2191_vm0, %v2189_v4  ;;  %v2097_v37 = vld [vmem:[%s2637_s6 + $0x10] ss:$8 sps:$4 sm:$0xff]  }
 0x658   : > { %2031 = vmatprep.subr.bf16.mxu0 %v2189_v4 }
 0x729   : > { %v965_v40 = vpop.f32.mrb[4].mxu0 }
 0x72a   : > { %v972_v41 = vpack.c.bf16 %v965_v40, %v965_v40  ;;  %v2017_v42 = vpop.f32.mrb[5].mxu0  ;;  %v2108_v40 = vld [vmem:[%s2638_s7 + $0x24] ss:$8 sps:$4 sm:$0xff]  }
 0x72b   : > { %v968_v44 = vpop.f32.mrb[6].mxu0  ;;  %v2106_v42 = vld [vmem:[%s2638_s7 + $0x20] ss:$8 sps:$4 sm:$0xff]  }
 0x72c   : > { %v973_v46 = vpack.c.bf16 %v968_v44, %v968_v44  ;;  %v2018_v47 = vpop.f32.mrb[7].mxu0  ;;  %2028 = vmatmul.mubr.msk.bf16.vlgmr.msra.gmra.mrb[12].mxu1 %vm621_vm1, %v972_v41  ;;  %v2103_v41 = vld [vmem:[%s2637_s6 + $0x20] ss:$8 sps:$4 sm:$0xff]  }
 0x72d   : > { %2039 = vmatprep.mubr.msk.bf16.mxu1 %vm2191_vm0, %v2189_v4 }
 0x72e   : > { %2022 = vmatmul.mubr.msk.bf16.vlgmr.msra.gmra.mrb[8].mxu0 %vm621_vm1, %v973_v46 }
 0x72f   : > { %2032 = vmatpush3.bf16.xpose.msra.mxu0 %v1081_v45  ;;  %2033 = vmatprep.mubr.msk.bf16.mxu0 %vm2191_vm0, %v2189_v4 }
 0x730   : > { %2043 = vmatprep.subr.bf16.mxu0 %v2189_v4 }
 0x736   : > { %2034 = vmatmul.mubr.msk.bf16.vlgmr.msra.gmra.mrb[12].mxu0 %vm621_vm1, %v1074_v48 }
 0x737   : > { %2045 = vmatprep.mubr.msk.bf16.mxu0 %vm2191_vm0, %v2189_v4 }
 0x7ff   : > { %v1066_v49 = vpop.f32.mrb[12].mxu1 }
 0x800   : > { %v2029_v50 = vpop.f32.mrb[13].mxu1 }
 0x801   : > { %v1017_v51 = vpop.f32.mrb[8].mxu0  ;;  %v1069_v52 = vpop.f32.mrb[14].mxu1 }
 0x802   : > { %v2462_v53 = vadd.f32 %v1066_v49, %v1017_v51  ;;  %v2023_v54 = vpop.f32.mrb[9].mxu0  ;;  %v2030_v55 = vpop.f32.mrb[15].mxu1 }
 0x803   : > { %v1020_v56 = vpop.f32.mrb[10].mxu0 }
 0x804   : > { %v2024_v57 = vpop.f32.mrb[11].mxu0  ;;  %v2111_v56 = vld [vmem:[%s2637_s6 + $0x34] ss:$8 sps:$4 sm:$0xff]  }
 0x805   : > { %v2109_v57 = vld [vmem:[%s2637_s6 + $0x30] ss:$8 sps:$4 sm:$0xff]  }
 0x809   : > { %v1117_v58 = vpop.f32.mrb[12].mxu0 }
 0x80a   : > { %v1124_v59 = vmul.f32 0.25, %v1117_v58  ;;  %v2035_v60 = vpop.f32.mrb[13].mxu0  ;;  %v2117_v58 = vld [vmem:[%s2637_s6 + $0x44] ss:$8 sps:$4 sm:$0xff]  }
 0x80b   : > { %v1120_v61 = vpop.f32.mrb[14].mxu0  ;;  %v2115_v60 = vld [vmem:[%s2637_s6 + $0x40] ss:$8 sps:$4 sm:$0xff]  }
 0x80c   : > { %v1125_v62 = vmul.f32 0.25, %v1120_v61  ;;  %v2036_v63 = vpop.f32.mrb[15].mxu0  ;;  %v1126_v0 = vadd.f32 %v1124_v59, %v2428_v10  ;;  %v2120_v59 = vld [vmem:[%s2638_s7 + $0x44] ss:$8 sps:$4 sm:$0xff]   ;;  %v2118_v61 = vld [vmem:[%s2638_s7 + $0x40] ss:$8 sps:$4 sm:$0xff]  }
 0x80d   : > { %v2126_v63 = vld [vmem:[%s2638_s7 + $0x54] ss:$8 sps:$4 sm:$0xff]  }
 0x80e   : > { %v1128_v1 = vsel %vm621_vm1, %v1126_v0, -inf  ;;  %v1127_v3 = vadd.f32 %v1125_v62, %v2428_v10  ;;  %v2089_v10 = vld [vmem:[%s2636_s5 + $0x10] sm:$0xff]  }
 0x80f   : > { %1129 = vmax.xlane.f32.xlu0 %v1128_v1  ;;  %2044 = vmatpush3.bf16.msra.mxu0 %v2089_v10  ;;  %v2123_v62 = vld [vmem:[%s2637_s6 + $0x54] ss:$8 sps:$4 sm:$0xff]   ;;  %v2124_v1 = vld [vmem:[%s2638_s7 + $0x50] ss:$8 sps:$4 sm:$0xff]  }
 0x810   : > { %v1131_v6 = vsel %vm621_vm1, %v1127_v3, -inf  ;;  %1413 = vmatprep.subr.bf16.mxu0 %v2093_v33 }
 0x811   : > { %1132 = vmax.xlane.f32.xlu1 %v1131_v6  ;;  %v2132_v6 = vld [vmem:[%s2638_s7 + $0x64] ss:$8 sps:$4 sm:$0xff]  }
 0x89c   : > { %v1130_v7 = vpop.xlane.xlu0 %1129 }
 0x89d   : > { %v1134_v8 = vsub.f32 %v1126_v0, %v1130_v7  ;;  %v2121_v0 = vld [vmem:[%s2637_s6 + $0x50] ss:$8 sps:$4 sm:$0xff]   ;;  %v2198_v7 = vmov 0  }
 0x89e   : > { %v1133_v9 = vpop.xlane.xlu1 %1132 }
 0x89f   : > { %v1136_v11 = vmul.f32 1.442695, %v1134_v8  ;;  %v1135_v12 = vsub.f32 %v1127_v3, %v1133_v9  ;;  %v2129_v3 = vld [vmem:[%s2637_s6 + $0x64] ss:$8 sps:$4 sm:$0xff]   ;;  %v2127_v8 = vld [vmem:[%s2637_s6 + $0x60] ss:$8 sps:$4 sm:$0xff]  }
 0x8a0   : > { %v2130_v9 = vld [vmem:[%s2638_s7 + $0x60] ss:$8 sps:$4 sm:$0xff]  }
 0x8a1   : > { %2159 = vpow2.f32 %v1136_v11  ;;  %v1138_v13 = vmul.f32 1.442695, %v1135_v12  ;;  %v2135_v11 = vld [vmem:[%s2637_s6 + $0x74] ss:$8 sps:$4 sm:$0xff]  }
 0x8a2   : > { %v2138_v12 = vld [vmem:[%s2638_s7 + $0x74] ss:$8 sps:$4 sm:$0xff]  }
 0x8a3   : > { %2161 = vpow2.f32 %v1138_v13  ;;  %v2133_v13 = vld [vmem:[%s2637_s6 + $0x70] ss:$8 sps:$4 sm:$0xff]  }
 0x8ab   : > { %v2160_v14 = vpop.eup %2159 }
 0x8ac   : > { %v1140_v15 = vsel %vm621_vm1, %v2160_v14, 0.0 }
 0x8ad   : > { %v2162_v16 = vpop.eup %2161  ;;  %1141 = vadd.xlane.f32.xlu0 %v1140_v15 }
 0x8ae   : > { %v1143_v17 = vsel %vm621_vm1, %v2162_v16, 0.0 }
 0x8b1   : > { %1144 = vadd.xlane.f32.xlu0 %v1143_v17 }
 0x8c7   : > { %1151 = vrot.lane.b32.xlu0 %v2414_v5, %s2197_s23  ;;  %v2090_v5 = vld [vmem:[%s2636_s5 + $0x18] sm:$0xff]  }
 0x93a   : > { %v1142_v18 = vpop.xlane.xlu0 %1141 }
 0x93b   : > { %2163 = vrcp.f32 %v1142_v18  ;;  %v1876_v18 = vld [vmem:[%s2634_s3] ss:$0 sm:$0xff] }
 0x93e   : > { %v1145_v19 = vpop.xlane.xlu0 %1144 }
 0x93f   : > { %2165 = vrcp.f32 %v1145_v19 }
 0x942   : > { %v1152_v20 = vpop.permute.xlu0 %1151 }
 0x943   : > { %2038 = vmatpush3.bf16.msra.mxu1 %v1152_v20 }
 0x944   : > { %2049 = vmatprep.subr.bf16.mxu1 %v2189_v4 }
 0x945   : > { %v2164_v21 = vpop.eup %2163 }
 0x946   : > { %v1148_v23 = vmul.f32 %v2164_v21, %v2160_v14  ;;  %v2136_v14 = vld [vmem:[%s2638_s7 + $0x70] ss:$8 sps:$4 sm:$0xff]   ;;  %v2139_v21 = vld [vmem:[%s2639_s8] sm:$0xff]  }
 0x949   : > { %v2166_v22 = vpop.eup %2165 }
 0x94a   : > { %v1149_v24 = vmul.f32 %v2166_v22, %v2162_v16 }
 0x94c   : > { %v1150_v25 = vpack.c.bf16 %v1149_v24, %v1148_v23  ;;  %v2140_v23 = vld [vmem:[%s2639_s8 + $0x8] sm:$0xff]   ;;  %v2141_v24 = vld [vmem:[%s2639_s8 + $0x10] sm:$0xff]  }
 0x94e   : > { %2040 = vmatmul.mubr.msk.bf16.vlgmr.msra.gmra.mrb[16].mxu1 %vm621_vm1, %v1150_v25  ;;  %v2143_v25 = vld [vmem:[%s2639_s8 + $0x20] sm:$0xff]  }
 0x94f   : > { %2050 = vmatpush3.bf16.msra.mxu1 %v2090_v5  ;;  %2051 = vmatprep.mubr.msk.bf16.mxu1 %vm2191_vm0, %v2189_v4  ;;  %v2094_v4 = vld [vmem:[%s2638_s7] ss:$8 sps:$4 sm:$0xff]   ;;  %v2142_v5 = vld [vmem:[%s2639_s8 + $0x18] sm:$0xff]  }
 0x950   : > { %1550 = vmatprep.subr.bf16.mxu1 %v2096_v34 }
 0xa21   : > { %v1191_v26 = vpop.f32.mrb[16].mxu1 }
 0xa22   : > { %v1198_v27 = vpack.c.bf16 %v1191_v26, %v1191_v26  ;;  %v2041_v28 = vpop.f32.mrb[17].mxu1  ;;  %v2144_v26 = vld [vmem:[%s2639_s8 + $0x28] sm:$0xff]  }
 0xa23   : > { %v1194_v29 = vpop.f32.mrb[18].mxu1  ;;  %v2146_v28 = vld [vmem:[%s2639_s8 + $0x38] sm:$0xff]  }
 0xa24   : > { %v1249_v30 = vpack.c.bf16 %v1194_v29, %v1194_v29  ;;  %v2042_v31 = vpop.f32.mrb[19].mxu1  ;;  %2046 = vmatmul.mubr.msk.bf16.vlgmr.msra.gmra.mrb[16].mxu0 %vm621_vm1, %v1198_v27  ;;  %v2145_v27 = vld [vmem:[%s2639_s8 + $0x30] sm:$0xff]   ;;  %v2147_v29 = vld [vmem:[%s2639_s8 + $0x40] sm:$0xff]  }
 0xa25   : > { %1414 = vmatpush1.bf16.msra.mxu0 %v2091_v32  ;;  %1445 = vmatprep.mubr.bf16.mxu0 %v2198_v7  ;;  %v2149_v31 = vld [vmem:[%s2639_s8 + $0x50] sm:$0xff]   ;;  %v2150_v32 = vld [vmem:[%s2639_s8 + $0x58] sm:$0xff]  }
 0xa26   : > { %2052 = vmatmul.mubr.msk.bf16.vlgmr.msra.gmra.mrb[20].mxu1 %vm621_vm1, %v1249_v30  ;;  %1415 = vmatprep.subr.bf16.mxu0 %v2099_v35  ;;  %v2148_v30 = vld [vmem:[%s2639_s8 + $0x48] sm:$0xff]  }
 0xa27   : > { %1551 = vmatpush1.bf16.msra.mxu1 %v2094_v4  ;;  %1582 = vmatprep.mubr.bf16.mxu1 %v2198_v7 }
 0xa28   : > { %1552 = vmatprep.subr.bf16.mxu1 %v2102_v36 }
 0xa29   : > { %1416 = vmatpush1.bf16.msra.mxu0 %v2097_v37 }
 0xa2a   : > { %1417 = vmatprep.subr.bf16.mxu0 %v2105_v39 }
 0xa2b   : > { %1553 = vmatpush1.bf16.msra.mxu1 %v2100_v38 }
 0xa2c   : > { %1554 = vmatprep.subr.bf16.mxu1 %v2108_v40 }
 0xa2d   : > { %1418 = vmatpush1.bf16.msra.mxu0 %v2103_v41 }
 0xa2e   : > { %1419 = vmatprep.subr.bf16.mxu0 %v2111_v56 }
 0xa2f   : > { %1555 = vmatpush1.bf16.msra.mxu1 %v2106_v42 }
 0xa31   : > { %1420 = vmatpush1.bf16.msra.mxu0 %v2109_v57 }
 0xa32   : > { %1421 = vmatprep.subr.bf16.mxu0 %v2117_v58 }
 0xa35   : > { %1422 = vmatpush1.bf16.msra.mxu0 %v2115_v60 }
 0xa36   : > { %1423 = vmatprep.subr.bf16.mxu0 %v2123_v62 }
 0xa39   : > { %1424 = vmatpush1.bf16.msra.mxu0 %v2121_v0 }
 0xa3a   : > { %1425 = vmatprep.subr.bf16.mxu0 %v2129_v3 }
 0xa3d   : > { %1426 = vmatpush1.bf16.msra.mxu0 %v2127_v8 }
 0xa3e   : > { %1427 = vmatprep.subr.bf16.mxu0 %v2135_v11 }
 0xa41   : > { %1428 = vmatpush1.bf16.msra.mxu0 %v2133_v13 }
 0xa42   : > { %1708 = vmatprep.subr.bf16.mxu0 %v2198_v7 }
 0xaf7   : > { %v1242_v43 = vpop.f32.mrb[16].mxu0 }
 0xaf8   : > { %v1248_v44 = vadd.f32 %v1242_v43, %v2462_v53  ;;  %v2047_v45 = vpop.f32.mrb[17].mxu0  ;;  %v2114_v53 = vld [vmem:[%s2638_s7 + $0x34] ss:$8 sps:$4 sm:$0xff]  }
 0xaf9   : > { %v1245_v46 = vpop.f32.mrb[18].mxu0  ;;  %v1293_v47 = vpop.f32.mrb[20].mxu1  ;;  %1556 = vmatprep.subr.bf16.mxu1 %v2114_v53 }
 0xafa   : > { %v1299_v48 = vadd.f32 %v1293_v47, %v1248_v44  ;;  %v2048_v49 = vpop.f32.mrb[19].mxu0  ;;  %v2053_v50 = vpop.f32.mrb[21].mxu1 }
 0xafb   : > { %v1296_v51 = vpop.f32.mrb[22].mxu1 }
 0xafc   : > { %v2521_v52 = vadd.f32 %v1299_v48, %v2310_v2  ;;  %v2054_v54 = vpop.f32.mrb[23].mxu1  ;;  %v2112_v2 = vld [vmem:[%s2638_s7 + $0x30] ss:$8 sps:$4 sm:$0xff]  }
 0xafd   : > { %1557 = vmatpush1.bf16.msra.mxu1 %v2112_v2 }
 0xafe   : > { %v1301_v55 = vmul.f32 %v2521_v52, %v2521_v52  ;;  %1558 = vmatprep.subr.bf16.mxu1 %v2120_v59 }
 0xb00   : > { %1302 = vadd.xlane.f32.xlu0 %v1301_v55 }
 0xb01   : > { %1559 = vmatpush1.bf16.msra.mxu1 %v2118_v61 }
 0xb02   : > { %1560 = vmatprep.subr.bf16.mxu1 %v2126_v63 }
 0xb05   : > { %1561 = vmatpush1.bf16.msra.mxu1 %v2124_v1 }
 0xb06   : > { %1562 = vmatprep.subr.bf16.mxu1 %v2132_v6 }
 0xb09   : > { %1563 = vmatpush1.bf16.msra.mxu1 %v2130_v9 }
 0xb0a   : > { %1564 = vmatprep.subr.bf16.mxu1 %v2138_v12 }
 0xb0d   : > { %1565 = vmatpush1.bf16.msra.mxu1 %v2136_v14 }
 0xb8d   : > { %v1303_v15 = vpop.xlane.xlu0 %1302 }
 0xb8e   : > { %v1304_v16 = vmul.f32 0.015625, %v1303_v15 }
 0xb90   : > { %v1305_v17 = vadd.f32 1e-05, %v1304_v16 }
 0xb92   : > { %2167 = vrsqrt.f32 %v1305_v17 }
 0xb9c   : > { %v2168_v10 = vpop.eup %2167 }
 0xb9d   : > { %v1307_v19 = vmul.f32 %v2168_v10, %v2521_v52 }
 0xb9f   : > { %v1315_v20 = vmul.f32 %v1876_v18, %v1307_v19 }
 0xba1   : > { %v1316_v22 = vpack.c.bf16 %v1315_v20, %v1315_v20 }
 0xba3   : > { %1446 = vmatmul.mubr.bf16.vlgmr.msra.gmra.mrb[20].mxu0 %v1316_v22  ;;  %1583 = vmatmul.mubr.bf16.vlgmr.msra.gmra.mrb[24].mxu1 %v1316_v22 }
 0xba4   : > { %1709 = vmatpush1.bf16.msra.mxu0 %v2139_v21 }
 0xba5   : > { %1710 = vmatprep.subr.bf16.mxu0 %v2198_v7 }
 0xba8   : > { %1711 = vmatpush1.bf16.msra.mxu0 %v2140_v23 }
 0xba9   : > { %1712 = vmatprep.subr.bf16.mxu0 %v2198_v7 }
 0xbac   : > { %1713 = vmatpush1.bf16.msra.mxu0 %v2141_v24 }
 0xbad   : > { %1714 = vmatprep.subr.bf16.mxu0 %v2198_v7 }
 0xbb0   : > { %1715 = vmatpush1.bf16.msra.mxu0 %v2142_v5 }
 0xbb1   : > { %1716 = vmatprep.subr.bf16.mxu0 %v2198_v7 }
 0xbb4   : > { %1717 = vmatpush1.bf16.msra.mxu0 %v2143_v25 }
 0xbb5   : > { %1718 = vmatprep.subr.bf16.mxu0 %v2198_v7 }
 0xbb8   : > { %1719 = vmatpush1.bf16.msra.mxu0 %v2144_v26 }
 0xbb9   : > { %1720 = vmatprep.subr.bf16.mxu0 %v2198_v7 }
 0xbbc   : > { %1721 = vmatpush1.bf16.msra.mxu0 %v2145_v27 }
 0xbbd   : > { %1722 = vmatprep.subr.bf16.mxu0 %v2198_v7 }
 0xbc0   : > { %1723 = vmatpush1.bf16.msra.mxu0 %v2146_v28 }
 0xbc1   : > { %1724 = vmatprep.subr.bf16.mxu0 %v2198_v7 }
 0xbc4   : > { %1725 = vmatpush1.bf16.msra.mxu0 %v2147_v29 }
 0xbc5   : > { %1726 = vmatprep.subr.bf16.mxu0 %v2198_v7 }
 0xbc8   : > { %1727 = vmatpush1.bf16.msra.mxu0 %v2148_v30 }
 0xbc9   : > { %1728 = vmatprep.subr.bf16.mxu0 %v2198_v7 }
 0xbcc   : > { %1729 = vmatpush1.bf16.msra.mxu0 %v2149_v31 }
 0xbcd   : > { %1730 = vmatprep.subr.bf16.mxu0 %v2198_v7 }
 0xbd0   : > { %1731 = vmatpush1.bf16.msra.mxu0 %v2150_v32 }
 0xc76   : > { %v1447_v33 = vpop.f32.mrb[20].mxu0  ;;  %v1584_v4 = vpop.f32.mrb[24].mxu1 }
 0xc77   : > { %v1909_v34 = vmul.f32 -1.442695, %v1447_v33  ;;  %v1449_v35 = vpop.f32.mrb[21].mxu0  ;;  %v1586_v36 = vpop.f32.mrb[25].mxu1 }
 0xc78   : > { %v1910_v37 = vmul.f32 -1.442695, %v1449_v35  ;;  %v1451_v38 = vpop.f32.mrb[22].mxu0  ;;  %v1588_v39 = vpop.f32.mrb[26].mxu1 }
 0xc79   : > { %2169 = vpow2.f32 %v1909_v34  ;;  %v1452_v40 = vpop.f32.mrb[23].mxu0  ;;  %v1589_v41 = vpop.f32.mrb[27].mxu1 }
 0xc7a   : > { %2171 = vpow2.f32 %v1910_v37 }
 0xc83   : > { %v2170_v42 = vpop.eup %2169 }
 0xc84   : > { %v2172_v43 = vpop.eup %2171  ;;  %v1597_v44 = vadd.f32 1.0, %v2170_v42 }
 0xc85   : > { %v1598_v45 = vadd.f32 1.0, %v2172_v43 }
 0xc86   : > { %2173 = vrcp.f32 %v1597_v44 }
 0xc87   : > { %2175 = vrcp.f32 %v1598_v45 }
 0xc90   : > { %v2174_v46 = vpop.eup %2173 }
 0xc91   : > { %v2176_v47 = vpop.eup %2175  ;;  %v1603_v48 = vmul.f32 %v2174_v46, %v1447_v33 }
 0xc92   : > { %v1604_v49 = vmul.f32 %v2176_v47, %v1449_v35 }
 0xc93   : > { %v1605_v50 = vmul.f32 %v1603_v48, %v1584_v4 }
 0xc94   : > { %v1606_v51 = vmul.f32 %v1604_v49, %v1586_v36 }
 0xc95   : > { %v1607_v55 = vpack.c.bf16 %v1605_v50, %v1605_v50 }
 0xc96   : > { %v1608_v54 = vpack.c.bf16 %v1606_v51, %v1606_v51 }
 0xc98   : > { %1923 = vmatprep.mubr.msk.bf16.mxu0 %vm675_vm4, %v1608_v54 }
 0xc99   : > { %1741 = vmatmul.mubr.bf16.vlgmr.msra.gmra.mrb[24].mxu0 %v1607_v55 }
 0xd6c   : > { %v1742_v56 = vpop.f32.mrb[24].mxu0 }
 0xd6d   : > { %v1748_v53 = vadd.f32 %v1742_v56, %v2521_v52  ;;  %v1744_v57 = vpop.f32.mrb[25].mxu0 }
 0xd6e   : > { %v1745_v2 = vpop.f32.mrb[26].mxu0 }
 0xd6f   : > { %1749 = vst [vmem:[%s2308_s18] sm:$0xff] %v1748_v53  ;;  %v1746_v58 = vpop.f32.mrb[27].mxu0 }
 0xd70   : > { %2183 = dma.done.wait [#allocation3 + $0x1], 128 }
 0xd71   : > { %2184 = vsyncadd [#allocation3 + $0x1], 4294967168 }
 0xd72 PF: > { %s27_s20 = sadd.s32 1, %s2187_s20  }
 0xd73   : > { %p24_p4 = scmp.ge.s32.totalorder %s27_s20, 4  }
 0xd75   :  { %26 = sbr.rel (!%p24_p4) target bundleno = 2 (0x2), region = 191 }
 0xd7c   :  { %1772 = vsyncmov [#allocation3] }
 0xd7f   :  { %s1773_s30 = vpop.sfrf %1772 }
 0xd80   :  { %p1926_p5 = scmp.ne.s32.totalorder %s1773_s30, 0 }
 0xd82   :  { %1777 = shalt.err (%p1926_p5)  }
 0xd83   :  { %1779 = vsyncmov [#allocation3 + $0x1] }
 0xd86   :  { %s1780_s16 = vpop.sfrf %1779 }
 0xd87   :  { %p1927_p6 = scmp.ne.s32.totalorder %s1780_s16, 0 }
 0xd89   :  { %1784 = shalt.err (%p1927_p6)  }

</bundles_post_ra>
